<compile_context>
chip_gen: v6e
topology: v6e:2x2x1
jax: 0.10.0
libtpu: 0.0.40
codegen_flags: <defaults>
</compile_context>

<pallas_src>
import functools

import jax
import jax.numpy as jnp
from jax import lax
from jax.experimental import pallas as pl
from jax.experimental.pallas import tpu as pltpu


def _vq_kernel(x_ref, e_ref, et_ref, e2_ref, q_ref, sse_ref, *, n_valid, tile_n):
    """One tile of tokens.

    x_ref  : (TN, D)  f32   tile of flattened inputs
    e_ref  : (D, K)   bf16  codebook (distance matmul)
    et_ref : (K, D)   f32   pre-transposed codebook (gather matmul)
    e2_ref : (1, K)   f32   precomputed sum(e^2, axis=0)
    q_ref  : (TN, D)  f32   quantized outputs for this tile
    sse_ref: (8, 128) f32   per-tile SSE partial (scalar broadcast into block)
    """
    x = x_ref[...]                                     # (TN, D) f32
    eb = e_ref[...]                                    # (D, K)  bf16
    e2 = e2_ref[...]                                   # (1, K)  f32
    tn = x.shape[0]
    k = eb.shape[1]

    # distances up to the per-row constant |x|^2 (argmin-invariant):
    #   dist = |e|^2 - 2 * x @ e
    xe = jnp.dot(x.astype(jnp.bfloat16), eb,
                 preferred_element_type=jnp.float32)   # (TN, K)  bf16 MXU
    dist = e2 - 2.0 * xe

    # first-occurrence argmin over the codebook axis (matches torch.argmin)
    k_iota = lax.broadcasted_iota(jnp.int32, (tn, k), 1)       # (TN, K)
    min_val = jnp.min(dist, axis=1, keepdims=True)             # (TN, 1)
    idx = jnp.min(jnp.where(dist == min_val, k_iota, k),
                  axis=1, keepdims=True)                       # (TN, 1) int32

    # one-hot gather back through the codebook; f32 keeps exact codebook rows.
    # TODO(synk): for large K (>= ~2048) replace with a per-row dynamic gather.
    onehot = (idx == k_iota).astype(jnp.float32)               # (TN, K)
    q = jnp.dot(onehot, et_ref[...],
                preferred_element_type=jnp.float32)            # (TN, D)
    q_ref[...] = q

    # per-tile sum of squared error for the loss (padded tail rows masked out)
    diff = q - x
    if n_valid % tile_n != 0:   # static Python condition; no cost when exact
        row = (pl.program_id(0) * tile_n
               + lax.broadcasted_iota(jnp.int32, (tn, 1), 0))
        diff = jnp.where(row < n_valid, diff, 0.0)
    tile_sse = jnp.sum(diff * diff)
    sse_ref[...] = jnp.zeros((8, 128), jnp.float32) + tile_sse


@functools.partial(jax.jit, static_argnames=("beta", "tile_n"))
def vector_quantizer(x, embeddings, beta=0.25, tile_n=256):
    """Forward pass of VectorQuantizer.

    x          : (..., D) input, trailing dim == embedding_dim D.
    embeddings : (D, K) codebook.
    Returns (quantized, loss); quantized has the shape/values of the module's
    straight-through output, loss its forward value.
    """
    D, K = embeddings.shape
    orig_shape = x.shape

    e_f32 = embeddings.astype(jnp.float32)
    flat_x = x.reshape(-1, D).astype(jnp.float32)
    N = flat_x.shape[0]

    num_tiles = pl.cdiv(N, tile_n)
    n_pad = num_tiles * tile_n
    if n_pad != N:
        flat_x = jnp.pad(flat_x, ((0, n_pad - N), (0, 0)))

    # Codebook-side work hoisted out of the kernel (done once, not per tile).
    e_bf16 = e_f32.astype(jnp.bfloat16)                    # (D, K) for distances
    e_t = e_f32.T                                          # (K, D) for the gather
    e2 = jnp.sum(e_f32 * e_f32, axis=0, keepdims=True)     # (1, K)

    kernel = functools.partial(_vq_kernel, n_valid=N, tile_n=tile_n)

    q_flat, sse_parts = pl.pallas_call(
        kernel,
        out_shape=(
            jax.ShapeDtypeStruct((n_pad, D), jnp.float32),
            jax.ShapeDtypeStruct((num_tiles * 8, 128), jnp.float32),
        ),
        grid_spec=pltpu.PrefetchScalarGridSpec(
            num_scalar_prefetch=0,
            grid=(num_tiles,),
            in_specs=[
                pl.BlockSpec((tile_n, D), lambda i: (i, 0)),   # x tile
                # Constant blocks below are fetched once (index never changes).
                # TODO(synk): for very large K on v7x (64 MiB VMEM), single-
                # buffer the codebook (pl.Buffered(1)) or DMA it to scratch.
                pl.BlockSpec((D, K), lambda i: (0, 0)),        # codebook bf16
                pl.BlockSpec((K, D), lambda i: (0, 0)),        # codebook^T f32
                pl.BlockSpec((1, K), lambda i: (0, 0)),        # |e|^2
            ],
            out_specs=[
                pl.BlockSpec((tile_n, D), lambda i: (i, 0)),   # quantized tile
                pl.BlockSpec((8, 128), lambda i: (i, 0)),      # per-tile SSE
            ],
        ),
        compiler_params=pltpu.CompilerParams(
            dimension_semantics=("parallel",),   # no cross-step dependence
            vmem_limit_bytes=48 * 1024 * 1024,
        ),
    )(flat_x, e_bf16, e_t, e2)

    sse = jnp.sum(sse_parts.reshape(num_tiles, 8, 128)[:, 0, 0])
    mse = sse / float(N * D)
    # forward values: e_latent_loss == q_latent_loss == mse
    loss = (beta + 1.0) * mse
    # straight-through estimator forward value: x + (q - x) == q
    quantized = q_flat[:N].reshape(orig_shape)
    return quantized, loss


if __name__ == "__main__":
    # Small deterministic example consistent with the module:
    #   num_embeddings K = 128, embedding_dim D = 64
    #   x: (B=2, H=16, W=16, C=D=64) -> N = 512 flattened tokens, 2 grid tiles
    key = jax.random.PRNGKey(0)
    k_x, k_e = jax.random.split(key)
    B, H, W = 2, 16, 16
    D, K = 64, 128
    beta = 0.25

    x = jax.random.normal(k_x, (B, H, W, D), dtype=jnp.float32)
    embeddings = jax.random.normal(k_e, (D, K), dtype=jnp.float32)

    quantized, loss = vector_quantizer(x, embeddings, beta=beta)
    quantized = jax.block_until_ready(quantized)
    loss = jax.block_until_ready(loss)

    # pure-JAX reference mirroring the kernel numerics (bf16 distance matmul)
    flat = x.reshape(-1, D)
    e_f32 = embeddings.astype(jnp.float32)
    xe = jnp.dot(flat.astype(jnp.bfloat16), e_f32.astype(jnp.bfloat16),
                 preferred_element_type=jnp.float32)
    dist = jnp.sum(e_f32 ** 2, axis=0)[None, :] - 2.0 * xe
    idx = jnp.argmin(dist, axis=1)
    q_ref = e_f32.T[idx].reshape(x.shape)
    loss_ref = (beta + 1.0) * jnp.mean((q_ref - x) ** 2)

    assert jnp.allclose(quantized, q_ref, atol=1e-5), "quantized mismatch"
    assert jnp.allclose(loss, loss_ref, rtol=1e-4, atol=1e-4), "loss mismatch"

    print("KERNEL_OK")
</pallas_src>

<mosaic_0001>
module attributes {stable_mosaic.version = 11 : i64} {
  func.func @_vq_kernel(%arg0: i32, %arg1: memref<256x64xf32, #tpu.memory_space<vmem>>, %arg2: memref<64x128xbf16, #tpu.memory_space<vmem>>, %arg3: memref<128x64xf32, #tpu.memory_space<vmem>>, %arg4: memref<1x128xf32, #tpu.memory_space<vmem>>, %arg5: memref<256x64xf32, #tpu.memory_space<vmem>>, %arg6: memref<8x128xf32, #tpu.memory_space<vmem>>) attributes {dimension_semantics = [#tpu.dimension_semantics<parallel>], iteration_bounds = array<i64: 2>, scalar_prefetch = 0 : i64, scratch_operands = 0 : i64, tpu.core_type = #tpu.core_type<tc>, window_params = [{transform_indices = @transform_0, window_bounds = array<i64: 256, 64>}, {pipeline_mode = #tpu.pipeline_mode<synchronous>, transform_indices = @transform_1, window_bounds = array<i64: 64, 128>}, {pipeline_mode = #tpu.pipeline_mode<synchronous>, transform_indices = @transform_2, window_bounds = array<i64: 128, 64>}, {pipeline_mode = #tpu.pipeline_mode<synchronous>, transform_indices = @transform_3, window_bounds = array<i64: 1, 128>}, {transform_indices = @transform_4, window_bounds = array<i64: 256, 64>}, {transform_indices = @transform_5, window_bounds = array<i64: 8, 128>}]} {
    %c0 = arith.constant 0 : index
    %c0_0 = arith.constant 0 : index
    %0 = vector.load %arg1[%c0, %c0_0] : memref<256x64xf32, #tpu.memory_space<vmem>>, vector<256x64xf32>
    %c0_1 = arith.constant 0 : index
    %c0_2 = arith.constant 0 : index
    %1 = vector.load %arg2[%c0_1, %c0_2] : memref<64x128xbf16, #tpu.memory_space<vmem>>, vector<64x128xbf16>
    %c0_3 = arith.constant 0 : index
    %c0_4 = arith.constant 0 : index
    %2 = vector.load %arg4[%c0_3, %c0_4] : memref<1x128xf32, #tpu.memory_space<vmem>>, vector<1x128xf32>
    %3 = arith.truncf %0 : vector<256x64xf32> to vector<256x64xbf16>
    %cst = arith.constant dense<0.000000e+00> : vector<256x128xf32>
    %4 = tpu.matmul %3, %1, %cst {dimension_numbers = #tpu.dot_dimension_numbers<[1], [0], [0], [1], [0, 0, 1, 1], [], []>} : vector<256x64xbf16>, vector<64x128xbf16>, vector<256x128xf32> -> vector<256x128xf32>
    %cst_5 = arith.constant 2.000000e+00 : f32
    %5 = vector.broadcast %cst_5 : f32 to vector<256x128xf32>
    %6 = arith.mulf %5, %4 : vector<256x128xf32>
    %7 = vector.broadcast %2 : vector<1x128xf32> to vector<256x128xf32>
    %8 = arith.subf %7, %6 : vector<256x128xf32>
    %9 = tpu.iota {dimensions = array<i32: 1>} : vector<256x128xi32>
    %cst_6 = arith.constant dense<0x7F800000> : vector<256xf32>
    %10 = vector.multi_reduction <minimumf>, %8, %cst_6 [1] : vector<256x128xf32> to vector<256xf32>
    %11 = vector.shape_cast %10 : vector<256xf32> to vector<256x1xf32>
    %12 = vector.broadcast %11 : vector<256x1xf32> to vector<256x128xf32>
    %13 = arith.cmpf oeq, %8, %12 : vector<256x128xf32>
    %c128_i32 = arith.constant 128 : i32
    %14 = vector.broadcast %c128_i32 : i32 to vector<256x128xi32>
    %15 = arith.select %13, %9, %14 : vector<256x128xi1>, vector<256x128xi32>
    %cst_7 = arith.constant dense<2147483647> : vector<256xi32>
    %16 = vector.multi_reduction <minsi>, %15, %cst_7 [1] : vector<256x128xi32> to vector<256xi32>
    %17 = vector.shape_cast %16 : vector<256xi32> to vector<256x1xi32>
    %18 = vector.broadcast %17 : vector<256x1xi32> to vector<256x128xi32>
    %19 = arith.cmpi eq, %18, %9 : vector<256x128xi32>
    %20 = arith.extui %19 : vector<256x128xi1> to vector<256x128xi32>
    %21 = arith.sitofp %20 : vector<256x128xi32> to vector<256x128xf32>
    %c0_8 = arith.constant 0 : index
    %c0_9 = arith.constant 0 : index
    %22 = vector.load %arg3[%c0_8, %c0_9] : memref<128x64xf32, #tpu.memory_space<vmem>>, vector<128x64xf32>
    %cst_10 = arith.constant dense<0.000000e+00> : vector<256x64xf32>
    %23 = tpu.matmul %21, %22, %cst_10 {dimension_numbers = #tpu.dot_dimension_numbers<[1], [0], [0], [1], [0, 0, 1, 1], [], []>} : vector<256x128xf32>, vector<128x64xf32>, vector<256x64xf32> -> vector<256x64xf32>
    %c0_11 = arith.constant 0 : index
    %c0_12 = arith.constant 0 : index
    %24 = vector.load %arg5[%c0_11, %c0_12] : memref<256x64xf32, #tpu.memory_space<vmem>>, vector<256x64xf32>
    tpu.vector_store %arg5[%c0_11, %c0_12], %23 {strides = array<i32>} : memref<256x64xf32, #tpu.memory_space<vmem>>, vector<256x64xf32>,
    %25 = arith.subf %23, %0 : vector<256x64xf32>
    %26 = arith.mulf %25, %25 : vector<256x64xf32>
    %27 = vector.shape_cast %26 : vector<256x64xf32> to vector<1x256x64xf32>
    %cst_13 = arith.constant dense<0.000000e+00> : vector<1xf32>
    %28 = vector.multi_reduction <add>, %27, %cst_13 [1, 2] : vector<1x256x64xf32> to vector<1xf32>
    %29 = vector.shape_cast %28 : vector<1xf32> to vector<1x1x1xf32>
    %30 = vector.extract %29[0, 0, 0] : f32 from vector<1x1x1xf32>
    %cst_14 = arith.constant 0.000000e+00 : f32
    %31 = vector.broadcast %cst_14 : f32 to vector<8x128xf32>
    %32 = vector.broadcast %30 : f32 to vector<8x128xf32>
    %33 = arith.addf %31, %32 : vector<8x128xf32>
    %c0_15 = arith.constant 0 : index
    %c0_16 = arith.constant 0 : index
    %34 = vector.load %arg6[%c0_15, %c0_16] : memref<8x128xf32, #tpu.memory_space<vmem>>, vector<8x128xf32>
    tpu.vector_store %arg6[%c0_15, %c0_16], %33 {strides = array<i32>} : memref<8x128xf32, #tpu.memory_space<vmem>>, vector<8x128xf32>,
    return
  }
  func.func @transform_0(%arg0: i32) -> (i32, i32) {
    %c0_i32 = arith.constant 0 : i32
    %c0_i32_0 = arith.constant 0 : i32
    return %arg0, %c0_i32 : i32, i32
  }
  func.func @transform_1(%arg0: i32) -> (i32, i32) {
    %c0_i32 = arith.constant 0 : i32
    %c0_i32_0 = arith.constant 0 : i32
    %c0_i32_1 = arith.constant 0 : i32
    return %c0_i32, %c0_i32_0 : i32, i32
  }
  func.func @transform_2(%arg0: i32) -> (i32, i32) {
    %c0_i32 = arith.constant 0 : i32
    %c0_i32_0 = arith.constant 0 : i32
    %c0_i32_1 = arith.constant 0 : i32
    return %c0_i32, %c0_i32_0 : i32, i32
  }
  func.func @transform_3(%arg0: i32) -> (i32, i32) {
    %c0_i32 = arith.constant 0 : i32
    %c0_i32_0 = arith.constant 0 : i32
    %c0_i32_1 = arith.constant 0 : i32
    return %c0_i32, %c0_i32_0 : i32, i32
  }
  func.func @transform_4(%arg0: i32) -> (i32, i32) {
    %c0_i32 = arith.constant 0 : i32
    %c0_i32_0 = arith.constant 0 : i32
    return %arg0, %c0_i32 : i32, i32
  }
  func.func @transform_5(%arg0: i32) -> (i32, i32) {
    %c0_i32 = arith.constant 0 : i32
    %c0_i32_0 = arith.constant 0 : i32
    return %arg0, %c0_i32 : i32, i32
  }
}

</mosaic_0001>

<bundles_post_ra>
// kernel: vector_quantizer.1
= control target key start
LH: loop header
LB: loop body
LE: loop exit
PB: predicated region body
PF: predicated region fallthrough
CT: control target
= control target key end

     0   :  { %11 = vsyncpa [#allocation3], 0  ;;  %s3415_s0 = inlined_call_operand.hbm [shape: f32[512,64], index: 0, kind: input, shape index: {}]   ;;  %s3416_s1 = inlined_call_operand.vmem [shape: bf16[64,128], index: 1, kind: input, shape index: {}]   ;;  %s3417_s2 = inlined_call_operand.vmem [shape: f32[128,64], index: 2, kind: input, shape index: {}]   ;;  %s3418_s3 = inlined_call_operand.vmem [shape: f32[1,128], index: 3, kind: input, shape index: {}]   ;;  %s3419_s4 = inlined_call_operand.hbm [shape: f32[512,64], index: 4, kind: output, shape index: {0}]   ;;  %s3420_s5 = inlined_call_operand.vmem [shape: f32[16,128], index: 5, kind: output, shape index: {1}]  }
   0x1   :  { %13 = vsyncpa [#allocation3 + $0x1], 0 }
   0x2   :  { %14 = vsyncpa [#allocation4], 0 }
   0x3   :  { %16 = vsyncpa [#allocation4 + $0x1], 0  ;;  %s2364_s18 = smov 0   ;;  %s2366_s19 = smov 0  }
   0x4   :  { %s2368_s20 = smov 0   ;;  %s2370_s21 = smov 0  }
   0x5 LB: > { %s2385_s22 = sadd.s32 4294967295, %s2325_s21   ;;  %s1822_s23 = sadd.s32 4294967294, %s2325_s21   ;;  %s2325_s21 = sphi %s2370_s21, %s3469_s21   ;;  %s2321_s20 = sphi %s2368_s20, %s3468_s20   ;;  %s2317_s19 = sphi %s2366_s19, %s3467_s19   ;;  %s2313_s18 = sphi %s2364_s18, %s3466_s18  }
   0x6   : > { %s2389_s24 = sadd.s32 1, %s2325_s21   ;;  %s29_s25 = sadd.s32 1, %s2321_s20 }
   0x7   : > { %s26_s26 = ssub.s32 %s2325_s21, %s2389_s24  ;;  %p36_p0 = scmp.ne.s32.totalorder %s2321_s20, %s2317_s19 }
   0x8   : > { %p27_p1 = scmp.eq.s32.totalorder %s26_s26, 0  ;;  %p37_p2 = scmp.eq.s32.totalorder %s2325_s21, 0 }
   0x9   : > { %p42_p3 = scmp.ne.s32.totalorder %s2317_s19, %s2313_s18  ;;  %p43_p4 = scmp.eq.s32.totalorder %s2385_s22, 0 }
   0xa   : > { %s2401_s27 = scalar_select %p27_p1, %s2321_s20, %s29_s25  }
   0xb   : > { %p2403_p5 = por %p37_p2, %p36_p0  ;;  %p2407_p6 = por %p43_p4, %p42_p3 }
   0xc   : > { %p129_p7 = scmp.eq.s32.totalorder %s2385_s22, 1  ;;  %p135_p8 = scmp.eq.s32.totalorder %s1822_s23, 1 }
   0xd   : > { %s3436_s29 = scalar_select %p2407_p6, 1, 0 }
   0xe   : > { %p2158_p10 = scmp.lt.s32.totalorder %s2325_s21, 2  ;;  %p2414_p11 = por %p129_p7, %p36_p0 }
   0xf   : > { %p2418_p12 = por %p135_p8, %p42_p3  ;;  %s190_s7 = sand.u32 1, %s2321_s20  }
  0x10   : > { %s3437_s30 = scalar_select %p2414_p11, 1, 0 }
  0x11   : > { %s3438_s6 = scalar_select %p2418_p12, 1, 0 }
  0x12   : > { %s1922_s8 = sshll.u32 %s2325_s21, 12  ;;  %s1825_s9 = sshll.u32 %s190_s7, 8 }
  0x13   : > { %s2427_s12 = scalar_lea.hbm %s3415_s0, %s1922_s8  ;;  %s194_s13 = scalar_lea.vmem [#allocation2], %s1825_s9 }
  0x14   : > { %s201_s14 = sshll.u32 %s194_s13, 4  ;;  %p2431_p13 = pnand %p2158_p10, %p2403_p5  ;;  %s2435_s14 = int_to_ptr.vmem [resolvable:$true] %s201_s14 }
  0x15   : > { %s2437_s16 = scalar_lea.sflag [#allocation3], %s190_s7  ;;  %s2233_s17 = scalar_lea.hbm %s2427_s12, 4096 }
  0x16   : > { %p2234_p0 = scmp.ne.s32.totalorder %s2427_s12, %s2233_s17  ;;  %p2235_p1 = pneg %p2431_p13 }
  0x17   : > { %s2238_s26 = scalar_lea.hbm %s3415_s0, 8192  ;;  %p2239_p4 = scmp.lt.s32.totalorder %s2427_s12, %s3415_s0 }
  0x18   : > { %p2236_p2 = pnand %p2235_p1, %p2234_p0  ;;  %p2240_p5 = scmp.lt.s32.totalorder %s2238_s26, %s2233_s17 }
  0x1a   : > { %p2237_p3 = pneg %p2236_p2  ;;  %p2241_p7 = por %p2240_p5, %p2239_p4 }
  0x1c   : > { %p2242_p8 = pnand %p2241_p7, %p2237_p3 }
  0x1e   : > { %2245 = shalt.err (!%p2242_p8)
}
  0x1f   : > { %s2246_s7 = scalar_lea.vmem %s2435_s14, 4096  ;;  %s2327_s9 = smov [#allocation2]  }
  0x20   : > { %p2247_p10 = scmp.ne.s32.totalorder %s2435_s14, %s2246_s7  ;;  %s2251_s10 = sshll.u32 %s2327_s9, 4  ;;  %s2252_s10 = int_to_ptr.vmem [resolvable:$false] %s2251_s10 }
  0x21   : > { %s2253_s11 = scalar_lea.vmem %s2252_s10, 8192  ;;  %p2254_p2 = scmp.lt.s32.totalorder %s2435_s14, %s2252_s10 }
  0x22   : > { %p2249_p9 = pnand %p2247_p10, %p2235_p1  ;;  %p2255_p12 = scmp.lt.s32.totalorder %s2253_s11, %s2246_s7 }
  0x24   : > { %p2250_p0 = pneg %p2249_p9  ;;  %p2256_p11 = por %p2255_p12, %p2254_p2 }
  0x26   : > { %p2257_p6 = pnand %p2256_p11, %p2250_p0 }
  0x28   : > { %2260 = shalt.err (!%p2257_p6)
}
  0x29   : > { %s2328_s13 = smov 128   ;;  %s2329_s17 = smov 8  }
  0x2a   : > { %2153 = dma.hbm_to_vmem [thread:$0]  (!%p2431_p13), %s2427_s12, 4096, %s2435_s14, %s2437_s16, %s2328_s13, %s2328_s13, %s2329_s17  }
  0x2b   : > { %p1828_p9 = scmp.ge.s32.totalorder %s2325_s21, 1  ;;  %p209_p1 = scmp.lt.s32.totalorder %s2325_s21, 3 }
  0x2d   : > { %p210_p3 = pnand %p1828_p9, %p209_p1 }
  0x2f   : > { %213 = sbr.rel (%p210_p3) target bundleno = 1169 (0x491), region = 36 }
  0x34   : > { %s2461_s23 = sand.u32 1, %s2317_s19   ;;  %p3440_p6 = scmp.ne.s32.totalorder %s3436_s29, 0 }
  0x35   : > { %s1829_s25 = sshll.u32 %s2461_s23, 8  ;;  %s216_s26 = scalar_lea.sflag [#allocation3], %s2461_s23 }
  0x36   : > { %s2467_s28 = scalar_lea.vmem [#allocation2], %s1829_s25 }
  0x37   : > { %2304 = dma.done.wait (%p3440_p6), %s216_s26, 4096  }
  0x38   : > { %2306 = vsyncadd (%p3440_p6), %s216_s26, 4294963200  ;;  %v2197_v0 = vld [vmem:[%s3416_s1 + $0x18] sm:$0xff]   ;;  %v2198_v1 = vld [vmem:[%s3416_s1 + $0x10] sm:$0xff]   ;;  %vm338_vm0 = vcmask 523264   ;;  %s3230_s16 = scalar_lea.vmem [#allocation5], %s1829_s25  ;;  %s1923_s25 = sshll.u32 %s2385_s22, 12 }
  0x39   : > { %1992 = vmatprep.subr.bf16.mxu0 %v2197_v0  ;;  %v2199_v2 = vld [vmem:[%s3416_s1 + $0x8] sm:$0xff]   ;;  %v257_v3 = vld [vmem:[%s2467_s28] sm:$0xff]  ;;  %v259_v7 = vld [vmem:[%s2467_s28 + $0x10] sm:$0xff]  ;;  %s1722_s8 = sshll.u32 %s3230_s16, 4  ;;  %s3365_s7 = scalar_lea.hbm %s3419_s4, %s1923_s25  ;;  %s3367_s8 = int_to_ptr.vmem [resolvable:$true] %s1722_s8 }
  0x3a   : > { %1993 = vmatpush3.bf16.msra.mxu0 %v2197_v0  ;;  %v258_v4 = vld [vmem:[%s2467_s28 + $0x8] sm:$0xff]  ;;  %v2200_v6 = vld [vmem:[%s3416_s1] sm:$0xff]   ;;  %v260_v8 = vld [vmem:[%s2467_s28 + $0x18] sm:$0xff]  ;;  %s1705_s9 = scalar_lea.sflag [#allocation4], %s2461_s23  ;;  %s2261_s10 = scalar_lea.vmem %s3367_s8, 4096 }
  0x3b   : > { %1994 = vmatprep.subr.bf16.mxu0 %v2198_v1  ;;  %v298_v5 = vpack.c.bf16 %v258_v4, %v257_v3  ;;  %v261_v9 = vld [vmem:[%s2467_s28 + $0x20] sm:$0xff]  ;;  %v262_v10 = vld [vmem:[%s2467_s28 + $0x28] sm:$0xff]  ;;  %v299_v11 = vpack.c.bf16 %v260_v8, %v259_v7  ;;  %v263_v13 = vld [vmem:[%s2467_s28 + $0x30] sm:$0xff]  ;;  %p2262_p11 = scmp.ne.s32.totalorder %s3367_s8, %s2261_s10  ;;  %p3463_p12 = scmp.ne.s32.totalorder %s3437_s30, 0 }
  0x3c   : > { %v300_v12 = vpack.c.bf16 %v262_v10, %v261_v9  ;;  %v264_v14 = vld [vmem:[%s2467_s28 + $0x38] sm:$0xff]  ;;  %v265_v15 = vld [vmem:[%s2467_s28 + $0x40] sm:$0xff]  ;;  %v266_v16 = vld [vmem:[%s2467_s28 + $0x48] sm:$0xff]  ;;  %s2331_s11 = smov [#allocation5]  }
  0x3d   : > { %2000 = vmatprep.mubr.msk.bf16.mxu0 %vm338_vm0, %v298_v5  ;;  %v301_v17 = vpack.c.bf16 %v264_v14, %v263_v13  ;;  %v302_v18 = vpack.c.bf16 %v266_v16, %v265_v15  ;;  %v267_v19 = vld [vmem:[%s2467_s28 + $0x50] sm:$0xff]  ;;  %v268_v20 = vld [vmem:[%s2467_s28 + $0x58] sm:$0xff]  ;;  %v269_v21 = vld [vmem:[%s2467_s28 + $0x60] sm:$0xff]  ;;  %p2263_p13 = pnand %p2262_p11, %p3463_p12  ;;  %s2265_s13 = sshll.u32 %s2331_s11, 4  ;;  %s2266_s13 = int_to_ptr.vmem [resolvable:$false] %s2265_s13 }
  0x3e   : > { %1995 = vmatpush3.bf16.msra.mxu0 %v2198_v1  ;;  %v270_v22 = vld [vmem:[%s2467_s28 + $0x68] sm:$0xff]  ;;  %v303_v23 = vpack.c.bf16 %v268_v20, %v267_v19  ;;  %v271_v25 = vld [vmem:[%s2467_s28 + $0x70] sm:$0xff]  ;;  %v272_v26 = vld [vmem:[%s2467_s28 + $0x78] sm:$0xff]  ;;  %s2267_s17 = scalar_lea.vmem %s2266_s13, 8192  ;;  %p2268_p5 = scmp.lt.s32.totalorder %s3367_s8, %s2266_s13 }
  0x3f   : > { %1996 = vmatprep.subr.bf16.mxu0 %v2199_v2  ;;  %v304_v24 = vpack.c.bf16 %v270_v22, %v269_v21  ;;  %v273_v27 = vld [vmem:[%s2467_s28 + $0x80] sm:$0xff]  ;;  %v274_v28 = vld [vmem:[%s2467_s28 + $0x88] sm:$0xff]  ;;  %v305_v29 = vpack.c.bf16 %v272_v26, %v271_v25  ;;  %v275_v31 = vld [vmem:[%s2467_s28 + $0x90] sm:$0xff]  ;;  %p2264_p4 = pneg %p2263_p13  ;;  %p2269_p7 = scmp.lt.s32.totalorder %s2267_s17, %s2261_s10 }
  0x40   : > { %v306_v30 = vpack.c.bf16 %v274_v28, %v273_v27  ;;  %v276_v32 = vld [vmem:[%s2467_s28 + $0x98] sm:$0xff]  ;;  %v277_v33 = vld [vmem:[%s2467_s28 + $0xa0] sm:$0xff]  ;;  %v278_v34 = vld [vmem:[%s2467_s28 + $0xa8] sm:$0xff] }
  0x41   : > { %v307_v35 = vpack.c.bf16 %v276_v32, %v275_v31  ;;  %v308_v36 = vpack.c.bf16 %v278_v34, %v277_v33  ;;  %v279_v37 = vld [vmem:[%s2467_s28 + $0xb0] sm:$0xff]  ;;  %v280_v38 = vld [vmem:[%s2467_s28 + $0xb8] sm:$0xff]  ;;  %v281_v39 = vld [vmem:[%s2467_s28 + $0xc0] sm:$0xff]  ;;  %p2270_p8 = por %p2269_p7, %p2268_p5 }
  0x42   : > { %1997 = vmatpush3.bf16.msra.mxu0 %v2199_v2  ;;  %v282_v40 = vld [vmem:[%s2467_s28 + $0xc8] sm:$0xff]  ;;  %v309_v41 = vpack.c.bf16 %v280_v38, %v279_v37  ;;  %v283_v43 = vld [vmem:[%s2467_s28 + $0xd0] sm:$0xff]  ;;  %v284_v44 = vld [vmem:[%s2467_s28 + $0xd8] sm:$0xff] }
  0x43   : > { %1998 = vmatprep.subr.bf16.mxu0 %v2200_v6  ;;  %v310_v42 = vpack.c.bf16 %v282_v40, %v281_v39  ;;  %v285_v45 = vld [vmem:[%s2467_s28 + $0xe0] sm:$0xff]  ;;  %v286_v46 = vld [vmem:[%s2467_s28 + $0xe8] sm:$0xff]  ;;  %v311_v47 = vpack.c.bf16 %v284_v44, %v283_v43  ;;  %v287_v49 = vld [vmem:[%s2467_s28 + $0xf0] sm:$0xff]  ;;  %p2271_p10 = pnand %p2270_p8, %p2264_p4 }
  0x44   : > { %v312_v48 = vpack.c.bf16 %v286_v46, %v285_v45  ;;  %v288_v50 = vld [vmem:[%s2467_s28 + $0xf8] sm:$0xff]  ;;  %v2536_v53 = vld [vmem:[%s3418_s3] ss:$0 sm:$0xff] }
  0x45   : > { %v313_v51 = vpack.c.bf16 %v288_v50, %v287_v49 }
  0x46   : > { %1999 = vmatpush3.bf16.msra.mxu0 %v2200_v6 }
  0x49   : > { %2001 = vmatmul.mubr.msk.bf16.vlgmr.msra.gmra.mxu0 %vm338_vm0, %v299_v11 }
  0x4a   : > { %2004 = vmatprep.mubr.msk.bf16.mxu0 %vm338_vm0, %v300_v12 }
  0x51   : > { %2005 = vmatmul.mubr.msk.bf16.gmra.mxu0 %vm338_vm0, %v301_v17 }
  0x52   : > { %2008 = vmatprep.mubr.msk.bf16.mxu0 %vm338_vm0, %v302_v18 }
  0x59   : > { %2009 = vmatmul.mubr.msk.bf16.gmra.mxu0 %vm338_vm0, %v303_v23 }
  0x5a   : > { %2012 = vmatprep.mubr.msk.bf16.mxu0 %vm338_vm0, %v304_v24 }
  0x61   : > { %2013 = vmatmul.mubr.msk.bf16.gmra.mxu0 %vm338_vm0, %v305_v29 }
  0x62   : > { %2016 = vmatprep.mubr.msk.bf16.mxu0 %vm338_vm0, %v306_v30 }
  0x69   : > { %2017 = vmatmul.mubr.msk.bf16.gmra.mxu0 %vm338_vm0, %v307_v35 }
  0x6a   : > { %2020 = vmatprep.mubr.msk.bf16.mxu0 %vm338_vm0, %v308_v36 }
  0x71   : > { %2021 = vmatmul.mubr.msk.bf16.gmra.mxu0 %vm338_vm0, %v309_v41 }
  0x72   : > { %2024 = vmatprep.mubr.msk.bf16.mxu0 %vm338_vm0, %v310_v42 }
  0x79   : > { %2025 = vmatmul.mubr.msk.bf16.gmra.mxu0 %vm338_vm0, %v311_v47 }
  0x7a   : > { %2028 = vmatprep.mubr.msk.bf16.mxu0 %vm338_vm0, %v312_v48 }
  0x81   : > { %2029 = vmatmul.mubr.msk.bf16.gmra.mxu0 %vm338_vm0, %v313_v51 }
 0x109   : > { %v2002_v52 = vpop.f32.mrf.mxu0 }
 0x10a   : > { %v550_v54 = vmul.f32 2.0, %v2002_v52 }
 0x10b   : > { %v421_v55 = vpop.f32.mrf.mxu0 }
 0x10c   : > { %v548_v56 = vmul.f32 2.0, %v421_v55  ;;  %v2539_v57 = vsub.f32 %v2536_v53, %v550_v54 }
 0x10d   : > { %v2003_v58 = vpop.f32.mrf.mxu0 }
 0x10e   : > { %v551_v59 = vmul.f32 2.0, %v2003_v58  ;;  %624 = vmin.xlane.f32.xlu1 %v2539_v57  ;;  %v2543_v60 = vsub.f32 %v2536_v53, %v548_v56 }
 0x10f   : > { %v424_v61 = vpop.f32.mrf.mxu0 }
 0x110   : > { %v549_v62 = vmul.f32 2.0, %v424_v61  ;;  %620 = vmin.xlane.f32.xlu0 %v2543_v60  ;;  %v2547_v63 = vsub.f32 %v2536_v53, %v551_v59 }
 0x111   : > { %v2006_v0 = vpop.f32.mrf.mxu0 }
 0x112   : > { %626 = vmin.xlane.f32.xlu1 %v2547_v63  ;;  %v2551_v1 = vsub.f32 %v2536_v53, %v549_v62  ;;  %v554_v5 = vmul.f32 2.0, %v2006_v0 }
 0x113   : > { %v437_v2 = vpop.f32.mrf.mxu0 }
 0x114   : > { %v552_v3 = vmul.f32 2.0, %v437_v2  ;;  %622 = vmin.xlane.f32.xlu0 %v2551_v1  ;;  %v2559_v11 = vsub.f32 %v2536_v53, %v554_v5 }
 0x115   : > { %v2007_v4 = vpop.f32.mrf.mxu0 }
 0x116   : > { %v2555_v6 = vsub.f32 %v2536_v53, %v552_v3  ;;  %v555_v10 = vmul.f32 2.0, %v2007_v4 }
 0x117   : > { %v440_v7 = vpop.f32.mrf.mxu0 }
 0x118   : > { %v553_v8 = vmul.f32 2.0, %v440_v7  ;;  %628 = vmin.xlane.f32.xlu0 %v2555_v6  ;;  %v2567_v17 = vsub.f32 %v2536_v53, %v555_v10 }
 0x119   : > { %v2010_v9 = vpop.f32.mrf.mxu0 }
 0x11a   : > { %v2562_v12 = vsub.f32 %v2536_v53, %v553_v8  ;;  %v558_v16 = vmul.f32 2.0, %v2010_v9 }
 0x11b   : > { %v453_v13 = vpop.f32.mrf.mxu0 }
 0x11c   : > { %v556_v14 = vmul.f32 2.0, %v453_v13  ;;  %632 = vmin.xlane.f32.xlu0 %v2559_v11  ;;  %630 = vmin.xlane.f32.xlu1 %v2562_v12  ;;  %v2575_v23 = vsub.f32 %v2536_v53, %v558_v16 }
 0x11d   : > { %v2011_v15 = vpop.f32.mrf.mxu0 }
 0x11e   : > { %v2570_v18 = vsub.f32 %v2536_v53, %v556_v14  ;;  %v559_v22 = vmul.f32 2.0, %v2011_v15 }
 0x11f   : > { %v456_v19 = vpop.f32.mrf.mxu0 }
 0x120   : > { %v557_v20 = vmul.f32 2.0, %v456_v19  ;;  %634 = vmin.xlane.f32.xlu1 %v2567_v17  ;;  %636 = vmin.xlane.f32.xlu0 %v2570_v18  ;;  %v2583_v29 = vsub.f32 %v2536_v53, %v559_v22 }
 0x121   : > { %v2014_v21 = vpop.f32.mrf.mxu0 }
 0x122   : > { %v2578_v24 = vsub.f32 %v2536_v53, %v557_v20  ;;  %v562_v28 = vmul.f32 2.0, %v2014_v21 }
 0x123   : > { %v469_v25 = vpop.f32.mrf.mxu0 }
 0x124   : > { %v560_v26 = vmul.f32 2.0, %v469_v25  ;;  %640 = vmin.xlane.f32.xlu0 %v2575_v23  ;;  %638 = vmin.xlane.f32.xlu1 %v2578_v24  ;;  %v2591_v35 = vsub.f32 %v2536_v53, %v562_v28 }
 0x125   : > { %v2015_v27 = vpop.f32.mrf.mxu0 }
 0x126   : > { %v2586_v30 = vsub.f32 %v2536_v53, %v560_v26  ;;  %v563_v34 = vmul.f32 2.0, %v2015_v27 }
 0x127   : > { %v472_v31 = vpop.f32.mrf.mxu0 }
 0x128   : > { %v561_v32 = vmul.f32 2.0, %v472_v31  ;;  %642 = vmin.xlane.f32.xlu1 %v2583_v29  ;;  %644 = vmin.xlane.f32.xlu0 %v2586_v30  ;;  %v2599_v41 = vsub.f32 %v2536_v53, %v563_v34 }
 0x129   : > { %v2018_v33 = vpop.f32.mrf.mxu0 }
 0x12a   : > { %v2594_v36 = vsub.f32 %v2536_v53, %v561_v32  ;;  %v566_v40 = vmul.f32 2.0, %v2018_v33 }
 0x12b   : > { %v485_v37 = vpop.f32.mrf.mxu0 }
 0x12c   : > { %v564_v38 = vmul.f32 2.0, %v485_v37  ;;  %648 = vmin.xlane.f32.xlu0 %v2591_v35  ;;  %646 = vmin.xlane.f32.xlu1 %v2594_v36  ;;  %v2607_v47 = vsub.f32 %v2536_v53, %v566_v40  ;;  %v618_v37 = vlaneseq }
 0x12d   : > { %v2019_v39 = vpop.f32.mrf.mxu0 }
 0x12e   : > { %v2602_v42 = vsub.f32 %v2536_v53, %v564_v38  ;;  %v567_v46 = vmul.f32 2.0, %v2019_v39  ;;  %v2666_v38 = vand.u32 127, %v618_v37 }
 0x12f   : > { %v488_v43 = vpop.f32.mrf.mxu0 }
 0x130   : > { %v565_v44 = vmul.f32 2.0, %v488_v43  ;;  %650 = vmin.xlane.f32.xlu1 %v2599_v41  ;;  %652 = vmin.xlane.f32.xlu0 %v2602_v42  ;;  %v2615_v54 = vsub.f32 %v2536_v53, %v567_v46  ;;  %3441 = vst [vmem:[#allocation8_spill] sm:$0xff] %v2666_v38 }
 0x131   : > { %v2022_v45 = vpop.f32.mrf.mxu0 }
 0x132   : > { %v2610_v48 = vsub.f32 %v2536_v53, %v565_v44  ;;  %v570_v52 = vmul.f32 2.0, %v2022_v45 }
 0x133   : > { %v501_v49 = vpop.f32.mrf.mxu0 }
 0x134   : > { %v568_v50 = vmul.f32 2.0, %v501_v49  ;;  %656 = vmin.xlane.f32.xlu0 %v2607_v47  ;;  %654 = vmin.xlane.f32.xlu1 %v2610_v48  ;;  %v2623_v62 = vsub.f32 %v2536_v53, %v570_v52 }
 0x135   : > { %v2023_v51 = vpop.f32.mrf.mxu0 }
 0x136   : > { %v2618_v55 = vsub.f32 %v2536_v53, %v568_v50  ;;  %v571_v61 = vmul.f32 2.0, %v2023_v51 }
 0x137   : > { %v504_v56 = vpop.f32.mrf.mxu0 }
 0x138   : > { %v569_v58 = vmul.f32 2.0, %v504_v56  ;;  %658 = vmin.xlane.f32.xlu1 %v2615_v54  ;;  %660 = vmin.xlane.f32.xlu0 %v2618_v55  ;;  %v2631_v7 = vsub.f32 %v2536_v53, %v571_v61 }
 0x139   : > { %v2026_v59 = vpop.f32.mrf.mxu0 }
 0x13a   : > { %v2626_v0 = vsub.f32 %v2536_v53, %v569_v58  ;;  %v574_v5 = vmul.f32 2.0, %v2026_v59 }
 0x13b   : > { %v517_v2 = vpop.f32.mrf.mxu0 }
 0x13c   : > { %v572_v3 = vmul.f32 2.0, %v517_v2  ;;  %664 = vmin.xlane.f32.xlu0 %v2623_v62  ;;  %662 = vmin.xlane.f32.xlu1 %v2626_v0  ;;  %v2639_v15 = vsub.f32 %v2536_v53, %v574_v5 }
 0x13d   : > { %v2027_v4 = vpop.f32.mrf.mxu0 }
 0x13e   : > { %v2634_v8 = vsub.f32 %v2536_v53, %v572_v3  ;;  %v575_v14 = vmul.f32 2.0, %v2027_v4 }
 0x13f   : > { %v520_v9 = vpop.f32.mrf.mxu0 }
 0x140   : > { %v573_v10 = vmul.f32 2.0, %v520_v9  ;;  %666 = vmin.xlane.f32.xlu1 %v2631_v7  ;;  %668 = vmin.xlane.f32.xlu0 %v2634_v8  ;;  %v2647_v25 = vsub.f32 %v2536_v53, %v575_v14 }
 0x141   : > { %v2030_v13 = vpop.f32.mrf.mxu0 }
 0x142   : > { %v2642_v16 = vsub.f32 %v2536_v53, %v573_v10  ;;  %v578_v22 = vmul.f32 2.0, %v2030_v13 }
 0x143   : > { %v533_v19 = vpop.f32.mrf.mxu0 }
 0x144   : > { %v576_v20 = vmul.f32 2.0, %v533_v19  ;;  %672 = vmin.xlane.f32.xlu0 %v2639_v15  ;;  %670 = vmin.xlane.f32.xlu1 %v2642_v16  ;;  %v2655_v32 = vsub.f32 %v2536_v53, %v578_v22 }
 0x145   : > { %v2031_v21 = vpop.f32.mrf.mxu0 }
 0x146   : > { %v2650_v26 = vsub.f32 %v2536_v53, %v576_v20  ;;  %v579_v31 = vmul.f32 2.0, %v2031_v21 }
 0x147   : > { %v536_v27 = vpop.f32.mrf.mxu0 }
 0x148   : > { %v577_v28 = vmul.f32 2.0, %v536_v27  ;;  %674 = vmin.xlane.f32.xlu1 %v2647_v25  ;;  %676 = vmin.xlane.f32.xlu0 %v2650_v26  ;;  %v2663_v34 = vsub.f32 %v2536_v53, %v579_v31 }
 0x14a   : > { %v2658_v33 = vsub.f32 %v2536_v53, %v577_v28 }
 0x14c   : > { %680 = vmin.xlane.f32.xlu0 %v2655_v32  ;;  %678 = vmin.xlane.f32.xlu1 %v2658_v33 }
 0x150   : > { %682 = vmin.xlane.f32.xlu1 %v2663_v34 }
 0x197   : > { %v625_v39 = vpop.xlane.xlu1 %624 }
 0x198   : > { %vm686_vm1 = vcmp.eq.f32.partialorder %v2539_v57, %v625_v39 }
 0x199   : > { %v621_v40 = vpop.xlane.xlu0 %620  ;;  %v2671_v43 = vsel %vm686_vm1, %v2666_v38, 128 }
 0x19a   : > { %vm684_vm2 = vcmp.eq.f32.partialorder %v2543_v60, %v621_v40  ;;  %v777_v57 = vshra.s32 %v2671_v43, 16 }
 0x19b   : > { %v2674_v44 = vsel %vm684_vm2, %v2666_v38, 128  ;;  %v627_v45 = vpop.xlane.xlu1 %626 }
 0x19c   : > { %vm687_vm3 = vcmp.eq.f32.partialorder %v2547_v63, %v627_v45  ;;  %v749_v53 = vshra.s32 %v2674_v44, 16  ;;  %v2691_v52 = vcvt.s32.f32 %v777_v57 }
 0x19d   : > { %v623_v46 = vpop.xlane.xlu0 %622  ;;  %v2683_v60 = vsel %vm687_vm3, %v2666_v38, 128 }
 0x19e   : > { %vm685_vm4 = vcmp.eq.f32.partialorder %v2551_v1, %v623_v46  ;;  %v2679_v49 = vcvt.s32.f32 %v749_v53  ;;  %v791_v56 = vshra.s32 %v2683_v60, 16 }
 0x19f   : > { %v2686_v50 = vsel %vm685_vm4, %v2666_v38, 128 }
 0x1a0   : > { %752 = vmin.xlane.f32.xlu0 %v2679_v49  ;;  %v763_v51 = vshra.s32 %v2686_v50, 16  ;;  %v2706_v3 = vcvt.s32.f32 %v791_v56 }
 0x1a1   : > { %v629_v63 = vpop.xlane.xlu0 %628 }
 0x1a2   : > { %vm688_vm5 = vcmp.eq.f32.partialorder %v2555_v6, %v629_v63  ;;  %v2693_v1 = vcvt.s32.f32 %v763_v51 }
 0x1a3   : > { %v2697_v58 = vsel %vm688_vm5, %v2666_v38, 128 }
 0x1a4   : > { %780 = vmin.xlane.f32.xlu0 %v2691_v52  ;;  %766 = vmin.xlane.f32.xlu1 %v2693_v1  ;;  %v805_v59 = vshra.s32 %v2697_v58, 16 }
 0x1a5   : > { %v633_v61 = vpop.xlane.xlu0 %632  ;;  %v631_v2 = vpop.xlane.xlu1 %630 }
 0x1a6   : > { %vm690_vm6 = vcmp.eq.f32.partialorder %v2559_v11, %v633_v61  ;;  %vm689_vm7 = vcmp.eq.f32.partialorder %v2562_v12, %v631_v2  ;;  %v2704_v6 = vcvt.s32.f32 %v805_v59 }
 0x1a7   : > { %v2709_v4 = vsel %vm690_vm6, %v2666_v38, 128  ;;  %v2712_v5 = vsel %vm689_vm7, %v2666_v38, 128 }
 0x1a8   : > { %808 = vmin.xlane.f32.xlu0 %v2704_v6  ;;  %794 = vmin.xlane.f32.xlu1 %v2706_v3  ;;  %v833_v9 = vshra.s32 %v2709_v4, 16  ;;  %v819_v11 = vshra.s32 %v2712_v5, 16 }
 0x1a9   : > { %v635_v10 = vpop.xlane.xlu1 %634  ;;  %v637_v12 = vpop.xlane.xlu0 %636 }
 0x1aa   : > { %vm691_vm8 = vcmp.eq.f32.partialorder %v2567_v17, %v635_v10  ;;  %vm692_vm9 = vcmp.eq.f32.partialorder %v2570_v18, %v637_v12  ;;  %v2720_v13 = vcvt.s32.f32 %v833_v9  ;;  %v2722_v14 = vcvt.s32.f32 %v819_v11 }
 0x1ab   : > { %v2725_v19 = vsel %vm691_vm8, %v2666_v38, 128  ;;  %v2728_v20 = vsel %vm692_vm9, %v2666_v38, 128 }
 0x1ac   : > { %836 = vmin.xlane.f32.xlu0 %v2720_v13  ;;  %822 = vmin.xlane.f32.xlu1 %v2722_v14  ;;  %v861_v21 = vshra.s32 %v2728_v20, 16  ;;  %v847_v17 = vshra.s32 %v2725_v19, 16 }
 0x1ad   : > { %v641_v22 = vpop.xlane.xlu0 %640  ;;  %v639_v18 = vpop.xlane.xlu1 %638 }
 0x1ae   : > { %vm694_vm10 = vcmp.eq.f32.partialorder %v2575_v23, %v641_v22  ;;  %vm693_vm11 = vcmp.eq.f32.partialorder %v2578_v24, %v639_v18  ;;  %v2736_v27 = vcvt.s32.f32 %v861_v21  ;;  %v2738_v28 = vcvt.s32.f32 %v847_v17 }
 0x1af   : > { %v2741_v31 = vsel %vm694_vm10, %v2666_v38, 128  ;;  %v2744_v37 = vsel %vm693_vm11, %v2666_v38, 128 }
 0x1b0   : > { %864 = vmin.xlane.f32.xlu0 %v2736_v27  ;;  %850 = vmin.xlane.f32.xlu1 %v2738_v28  ;;  %v889_v39 = vshra.s32 %v2741_v31, 16  ;;  %v875_v23 = vshra.s32 %v2744_v37, 16 }
 0x1b1   : > { %v643_v40 = vpop.xlane.xlu1 %642  ;;  %v645_v24 = vpop.xlane.xlu0 %644 }
 0x1b2   : > { %vm695_vm12 = vcmp.eq.f32.partialorder %v2583_v29, %v643_v40  ;;  %vm696_vm13 = vcmp.eq.f32.partialorder %v2586_v30, %v645_v24  ;;  %v2752_v45 = vcvt.s32.f32 %v889_v39  ;;  %v2754_v53 = vcvt.s32.f32 %v875_v23 }
 0x1b3   : > { %v2757_v46 = vsel %vm695_vm12, %v2666_v38, 128  ;;  %v2760_v57 = vsel %vm696_vm13, %v2666_v38, 128 }
 0x1b4   : > { %892 = vmin.xlane.f32.xlu0 %v2752_v45  ;;  %878 = vmin.xlane.f32.xlu1 %v2754_v53  ;;  %v917_v51 = vshra.s32 %v2760_v57, 16  ;;  %v903_v29 = vshra.s32 %v2757_v46, 16 }
 0x1b5   : > { %v649_v63 = vpop.xlane.xlu0 %648  ;;  %v647_v30 = vpop.xlane.xlu1 %646 }
 0x1b6   : > { %vm698_vm14 = vcmp.eq.f32.partialorder %v2591_v35, %v649_v63  ;;  %vm697_vm15 = vcmp.eq.f32.partialorder %v2594_v36, %v647_v30  ;;  %v2768_v56 = vcvt.s32.f32 %v917_v51  ;;  %v2770_v59 = vcvt.s32.f32 %v903_v29 }
 0x1b7   : > { %v2773_v61 = vsel %vm698_vm14, %v2666_v38, 128  ;;  %v2776_v2 = vsel %vm697_vm15, %v2666_v38, 128 }
 0x1b8   : > { %920 = vmin.xlane.f32.xlu0 %v2768_v56  ;;  %906 = vmin.xlane.f32.xlu1 %v2770_v59  ;;  %v945_v9 = vshra.s32 %v2773_v61, 16  ;;  %v931_v35 = vshra.s32 %v2776_v2, 16 }
 0x1b9   : > { %v651_v11 = vpop.xlane.xlu1 %650  ;;  %v653_v36 = vpop.xlane.xlu0 %652 }
 0x1ba   : > { %vm699_vm1 = vcmp.eq.f32.partialorder %v2599_v41, %v651_v11  ;;  %vm700_vm2 = vcmp.eq.f32.partialorder %v2602_v42, %v653_v36  ;;  %v2784_v10 = vcvt.s32.f32 %v945_v9  ;;  %v2786_v12 = vcvt.s32.f32 %v931_v35 }
 0x1bb   : > { %v2789_v21 = vsel %vm699_vm1, %v2666_v38, 128  ;;  %v2792_v17 = vsel %vm700_vm2, %v2666_v38, 128 }
 0x1bc   : > { %948 = vmin.xlane.f32.xlu0 %v2784_v10  ;;  %934 = vmin.xlane.f32.xlu1 %v2786_v12  ;;  %v973_v22 = vshra.s32 %v2792_v17, 16  ;;  %v959_v41 = vshra.s32 %v2789_v21, 16 }
 0x1bd   : > { %v657_v18 = vpop.xlane.xlu0 %656  ;;  %v655_v42 = vpop.xlane.xlu1 %654 }
 0x1be   : > { %vm702_vm3 = vcmp.eq.f32.partialorder %v2607_v47, %v657_v18  ;;  %vm701_vm4 = vcmp.eq.f32.partialorder %v2610_v48, %v655_v42  ;;  %v2800_v39 = vcvt.s32.f32 %v973_v22  ;;  %v2802_v23 = vcvt.s32.f32 %v959_v41 }
 0x1bf   : > { %v2805_v40 = vsel %vm702_vm3, %v2666_v38, 128  ;;  %v2808_v24 = vsel %vm701_vm4, %v2666_v38, 128 }
 0x1c0   : > { %976 = vmin.xlane.f32.xlu0 %v2800_v39  ;;  %962 = vmin.xlane.f32.xlu1 %v2802_v23  ;;  %v1001_v51 = vshra.s32 %v2805_v40, 16  ;;  %v987_v47 = vshra.s32 %v2808_v24, 16 }
 0x1c1   : > { %v659_v29 = vpop.xlane.xlu1 %658  ;;  %v661_v48 = vpop.xlane.xlu0 %660 }
 0x1c2   : > { %vm703_vm5 = vcmp.eq.f32.partialorder %v2615_v54, %v659_v29  ;;  %vm704_vm6 = vcmp.eq.f32.partialorder %v2618_v55, %v661_v48  ;;  %v2816_v63 = vcvt.s32.f32 %v1001_v51  ;;  %v2818_v30 = vcvt.s32.f32 %v987_v47 }
 0x1c3   : > { %v2821_v9 = vsel %vm703_vm5, %v2666_v38, 128  ;;  %v2824_v35 = vsel %vm704_vm6, %v2666_v38, 128 }
 0x1c4   : > { %1004 = vmin.xlane.f32.xlu0 %v2816_v63  ;;  %990 = vmin.xlane.f32.xlu1 %v2818_v30  ;;  %v1029_v11 = vshra.s32 %v2824_v35, 16  ;;  %v1015_v54 = vshra.s32 %v2821_v9, 16 }
 0x1c5   : > { %v665_v36 = vpop.xlane.xlu0 %664  ;;  %v663_v55 = vpop.xlane.xlu1 %662 }
 0x1c6   : > { %vm706_vm7 = vcmp.eq.f32.partialorder %v2623_v62, %v665_v36  ;;  %vm705_vm8 = vcmp.eq.f32.partialorder %v2626_v0, %v663_v55  ;;  %v2832_v22 = vcvt.s32.f32 %v1029_v11  ;;  %v2834_v41 = vcvt.s32.f32 %v1015_v54 }
 0x1c7   : > { %v2837_v18 = vsel %vm706_vm7, %v2666_v38, 128  ;;  %v2840_v42 = vsel %vm705_vm8, %v2666_v38, 128 }
 0x1c8   : > { %1032 = vmin.xlane.f32.xlu0 %v2832_v22  ;;  %1018 = vmin.xlane.f32.xlu1 %v2834_v41  ;;  %v1057_v51 = vshra.s32 %v2837_v18, 16  ;;  %v1043_v62 = vshra.s32 %v2840_v42, 16 }
 0x1c9   : > { %v667_v47 = vpop.xlane.xlu1 %666  ;;  %v669_v0 = vpop.xlane.xlu0 %668 }
 0x1ca   : > { %vm707_vm9 = vcmp.eq.f32.partialorder %v2631_v7, %v667_v47  ;;  %vm708_vm10 = vcmp.eq.f32.partialorder %v2634_v8, %v669_v0  ;;  %v2848_v29 = vcvt.s32.f32 %v1057_v51  ;;  %v2850_v48 = vcvt.s32.f32 %v1043_v62 }
 0x1cb   : > { %v2853_v11 = vsel %vm707_vm9, %v2666_v38, 128  ;;  %v2856_v54 = vsel %vm708_vm10, %v2666_v38, 128 }
 0x1cc   : > { %3442 = vst [vmem:[#allocation9_spill] sm:$0xff] %v2850_v48  ;;  %1060 = vmin.xlane.f32.xlu0 %v2848_v29  ;;  %1046 = vmin.xlane.f32.xlu1 %v2850_v48  ;;  %v1085_v36 = vshra.s32 %v2856_v54, 16  ;;  %v1071_v7 = vshra.s32 %v2853_v11, 16 }
 0x1cd   : > { %v673_v55 = vpop.xlane.xlu0 %672  ;;  %v671_v8 = vpop.xlane.xlu1 %670 }
 0x1ce   : > { %vm710_vm11 = vcmp.eq.f32.partialorder %v2639_v15, %v673_v55  ;;  %vm709_vm12 = vcmp.eq.f32.partialorder %v2642_v16, %v671_v8  ;;  %v2864_v51 = vcvt.s32.f32 %v1085_v36  ;;  %v2866_v62 = vcvt.s32.f32 %v1071_v7 }
 0x1cf   : > { %v2869_v47 = vsel %vm710_vm11, %v2666_v38, 128  ;;  %v2872_v0 = vsel %vm709_vm12, %v2666_v38, 128 }
 0x1d0   : > { %3443 = vst [vmem:[#allocation10_spill] sm:$0xff] %v2864_v51  ;;  %3444 = vst [vmem:[#allocation11_spill] sm:$0xff] %v2866_v62  ;;  %1088 = vmin.xlane.f32.xlu0 %v2864_v51  ;;  %1074 = vmin.xlane.f32.xlu1 %v2866_v62  ;;  %v1113_v48 = vshra.s32 %v2869_v47, 16  ;;  %v1099_v15 = vshra.s32 %v2872_v0, 16 }
 0x1d1   : > { %v675_v55 = vpop.xlane.xlu1 %674  ;;  %v677_v16 = vpop.xlane.xlu0 %676 }
 0x1d2   : > { %vm711_vm13 = vcmp.eq.f32.partialorder %v2647_v25, %v675_v55  ;;  %vm712_vm14 = vcmp.eq.f32.partialorder %v2650_v26, %v677_v16  ;;  %v2880_v36 = vcvt.s32.f32 %v1113_v48  ;;  %v2882_v7 = vcvt.s32.f32 %v1099_v15 }
 0x1d3   : > { %v2885_v8 = vsel %vm711_vm13, %v2666_v38, 128  ;;  %v2888_v51 = vsel %vm712_vm14, %v2666_v38, 128 }
 0x1d4   : > { %3445 = vst [vmem:[#allocation12_spill] sm:$0xff] %v2880_v36  ;;  %3446 = vst [vmem:[#allocation13_spill] sm:$0xff] %v2882_v7  ;;  %1116 = vmin.xlane.f32.xlu0 %v2880_v36  ;;  %1102 = vmin.xlane.f32.xlu1 %v2882_v7  ;;  %v1141_v62 = vshra.s32 %v2888_v51, 16  ;;  %v1127_v25 = vshra.s32 %v2885_v8, 16 }
 0x1d5   : > { %v681_v55 = vpop.xlane.xlu0 %680  ;;  %v679_v26 = vpop.xlane.xlu1 %678 }
 0x1d6   : > { %vm714_vm15 = vcmp.eq.f32.partialorder %v2655_v32, %v681_v55  ;;  %vm713_vm1 = vcmp.eq.f32.partialorder %v2658_v33, %v679_v26  ;;  %v2896_v48 = vcvt.s32.f32 %v1141_v62  ;;  %v2898_v15 = vcvt.s32.f32 %v1127_v25 }
 0x1d7   : > { %v2901_v16 = vsel %vm714_vm15, %v2666_v38, 128  ;;  %v2904_v36 = vsel %vm713_vm1, %v2666_v38, 128 }
 0x1d8   : > { %3447 = vst [vmem:[#allocation14_spill] sm:$0xff] %v2898_v15  ;;  %1144 = vmin.xlane.f32.xlu0 %v2896_v48  ;;  %1130 = vmin.xlane.f32.xlu1 %v2898_v15  ;;  %v1169_v7 = vshra.s32 %v2901_v16, 16  ;;  %v1155_v32 = vshra.s32 %v2904_v36, 16 }
 0x1d9   : > { %v683_v55 = vpop.xlane.xlu1 %682 }
 0x1da   : > { %vm715_vm2 = vcmp.eq.f32.partialorder %v2663_v34, %v683_v55  ;;  %v2911_v33 = vcvt.s32.f32 %v1169_v7  ;;  %v2913_v62 = vcvt.s32.f32 %v1155_v32  ;;  %v1307_v34 = vld [vmem:[%s3417_s2 + $0x78] sm:$0xff]  ;;  %v1306_v7 = vld [vmem:[%s3417_s2 + $0x70] sm:$0xff]  ;;  %v1305_v32 = vld [vmem:[%s3417_s2 + $0x68] sm:$0xff] }
 0x1db   : > { %v2916_v25 = vsel %vm715_vm2, %v2666_v38, 128  ;;  %2032 = vmatprep.subr.mxu0 %v1307_v34  ;;  %2112 = vmatprep.subr.mxu1 %v1307_v34  ;;  %v1304_v55 = vld [vmem:[%s3417_s2 + $0x60] sm:$0xff]  ;;  %v762_v38 = vand.u32 65535, %v2686_v50 }
 0x1dc   : > { %3448 = vst [vmem:[#allocation15_spill] sm:$0xff] %v2911_v33  ;;  %3449 = vst [vmem:[#allocation16_spill] sm:$0xff] %v2913_v62  ;;  %1172 = vmin.xlane.f32.xlu0 %v2911_v33  ;;  %1158 = vmin.xlane.f32.xlu1 %v2913_v62  ;;  %v1183_v26 = vshra.s32 %v2916_v25, 16  ;;  %v804_v33 = vand.u32 65535, %v2697_v58  ;;  %v818_v58 = vand.u32 65535, %v2712_v5  ;;  %v860_v5 = vand.u32 65535, %v2728_v20 }
 0x1dd   : > { %3450 = vst [vmem:[#allocation17_spill] sm:$0xff] %v2916_v25  ;;  %2033 = vmatpush3.msra.mxu0 %v1307_v34  ;;  %2128 = vmatpush3.msra.mxu1 %v1307_v34  ;;  %v1302_v34 = vld [vmem:[%s3417_s2 + $0x50] sm:$0xff]  ;;  %v888_v20 = vand.u32 65535, %v2741_v31 }
 0x1de   : > { %v2921_v15 = vcvt.s32.f32 %v1183_v26  ;;  %2034 = vmatprep.subr.mxu0 %v1306_v7  ;;  %2113 = vmatprep.subr.mxu1 %v1306_v7  ;;  %v1303_v26 = vld [vmem:[%s3417_s2 + $0x58] sm:$0xff] }
 0x1df   : > { %2035 = vmatpush3.msra.mxu0 %v1306_v7  ;;  %2129 = vmatpush3.msra.mxu1 %v1306_v7  ;;  %v1301_v7 = vld [vmem:[%s3417_s2 + $0x48] sm:$0xff] }
 0x1e0   : > { %3451 = vst [vmem:[#allocation18_spill] sm:$0xff] %v2921_v15  ;;  %1186 = vmin.xlane.f32.xlu1 %v2921_v15  ;;  %2036 = vmatprep.subr.mxu0 %v1305_v32 }
 0x1e1   : > { %2114 = vmatprep.subr.mxu1 %v1305_v32  ;;  %2037 = vmatpush3.msra.mxu0 %v1305_v32 }
 0x1e2   : > { %2130 = vmatpush3.msra.mxu1 %v1305_v32  ;;  %2038 = vmatprep.subr.mxu0 %v1304_v55  ;;  %v1300_v32 = vld [vmem:[%s3417_s2 + $0x40] sm:$0xff] }
 0x1e3   : > { %2115 = vmatprep.subr.mxu1 %v1304_v55  ;;  %2039 = vmatpush3.msra.mxu0 %v1304_v55 }
 0x1e4   : > { %2131 = vmatpush3.msra.mxu1 %v1304_v55  ;;  %2040 = vmatprep.subr.mxu0 %v1303_v26  ;;  %v1299_v55 = vld [vmem:[%s3417_s2 + $0x38] sm:$0xff] }
 0x1e5   : > { %2116 = vmatprep.subr.mxu1 %v1303_v26  ;;  %2041 = vmatpush3.msra.mxu0 %v1303_v26 }
 0x1e6   : > { %2132 = vmatpush3.msra.mxu1 %v1303_v26  ;;  %2042 = vmatprep.subr.mxu0 %v1302_v34  ;;  %v1298_v26 = vld [vmem:[%s3417_s2 + $0x30] sm:$0xff] }
 0x1e7   : > { %2117 = vmatprep.subr.mxu1 %v1302_v34  ;;  %2043 = vmatpush3.msra.mxu0 %v1302_v34 }
 0x1e8   : > { %2133 = vmatpush3.msra.mxu1 %v1302_v34  ;;  %2044 = vmatprep.subr.mxu0 %v1301_v7  ;;  %v1297_v34 = vld [vmem:[%s3417_s2 + $0x28] sm:$0xff] }
 0x1e9   : > { %2118 = vmatprep.subr.mxu1 %v1301_v7  ;;  %2045 = vmatpush3.msra.mxu0 %v1301_v7 }
 0x1ea   : > { %2134 = vmatpush3.msra.mxu1 %v1301_v7  ;;  %2046 = vmatprep.subr.mxu0 %v1300_v32  ;;  %v1296_v7 = vld [vmem:[%s3417_s2 + $0x20] sm:$0xff] }
 0x1eb   : > { %2119 = vmatprep.subr.mxu1 %v1300_v32  ;;  %2047 = vmatpush3.msra.mxu0 %v1300_v32 }
 0x1ec   : > { %2135 = vmatpush3.msra.mxu1 %v1300_v32  ;;  %2048 = vmatprep.subr.mxu0 %v1299_v55  ;;  %v1295_v32 = vld [vmem:[%s3417_s2 + $0x18] sm:$0xff] }
 0x1ed   : > { %2120 = vmatprep.subr.mxu1 %v1299_v55  ;;  %2049 = vmatpush3.msra.mxu0 %v1299_v55 }
 0x1ee   : > { %2136 = vmatpush3.msra.mxu1 %v1299_v55  ;;  %2050 = vmatprep.subr.mxu0 %v1298_v26  ;;  %v1294_v55 = vld [vmem:[%s3417_s2 + $0x10] sm:$0xff] }
 0x1ef   : > { %2121 = vmatprep.subr.mxu1 %v1298_v26  ;;  %2051 = vmatpush3.msra.mxu0 %v1298_v26 }
 0x1f0   : > { %2137 = vmatpush3.msra.mxu1 %v1298_v26  ;;  %2052 = vmatprep.subr.mxu0 %v1297_v34  ;;  %v748_v26 = vand.u32 65535, %v2674_v44 }
 0x1f1   : > { %2122 = vmatprep.subr.mxu1 %v1297_v34  ;;  %2053 = vmatpush3.msra.mxu0 %v1297_v34 }
 0x1f2   : > { %2138 = vmatpush3.msra.mxu1 %v1297_v34  ;;  %2054 = vmatprep.subr.mxu0 %v1296_v7  ;;  %v776_v34 = vand.u32 65535, %v2671_v43  ;;  %v750_v62 = vcvt.s32.f32 %v748_v26  ;;  %v764_v43 = vcvt.s32.f32 %v762_v38 }
 0x1f3   : > { %2123 = vmatprep.subr.mxu1 %v1296_v7  ;;  %2055 = vmatpush3.msra.mxu0 %v1296_v7 }
 0x1f4   : > { %2139 = vmatpush3.msra.mxu1 %v1296_v7  ;;  %2056 = vmatprep.subr.mxu0 %v1295_v32  ;;  %v778_v44 = vcvt.s32.f32 %v776_v34  ;;  %v806_v34 = vcvt.s32.f32 %v804_v33 }
 0x1f5   : > { %2124 = vmatprep.subr.mxu1 %v1295_v32  ;;  %2057 = vmatpush3.msra.mxu0 %v1295_v32 }
 0x1f6   : > { %2140 = vmatpush3.msra.mxu1 %v1295_v32  ;;  %2058 = vmatprep.subr.mxu0 %v1294_v55  ;;  %v790_v32 = vand.u32 65535, %v2683_v60  ;;  %v832_v60 = vand.u32 65535, %v2709_v4  ;;  %v846_v4 = vand.u32 65535, %v2725_v19  ;;  %v1293_v19 = vld [vmem:[%s3417_s2 + $0x8] sm:$0xff] }
 0x1f7   : > { %2125 = vmatprep.subr.mxu1 %v1294_v55  ;;  %2059 = vmatpush3.msra.mxu0 %v1294_v55 }
 0x1f8   : > { %2141 = vmatpush3.msra.mxu1 %v1294_v55  ;;  %v792_v38 = vcvt.s32.f32 %v790_v32  ;;  %v834_v33 = vcvt.s32.f32 %v832_v60  ;;  %v820_v32 = vcvt.s32.f32 %v818_v58  ;;  %v848_v60 = vcvt.s32.f32 %v846_v4  ;;  %2060 = vmatprep.subr.mxu0 %v1293_v19 }
 0x1f9   : > { %2126 = vmatprep.subr.mxu1 %v1293_v19  ;;  %2061 = vmatpush3.msra.mxu0 %v1293_v19  ;;  %v916_v58 = vand.u32 65535, %v2760_v57  ;;  %v944_v57 = vand.u32 65535, %v2773_v61  ;;  %v930_v4 = vand.u32 65535, %v2776_v2  ;;  %v958_v61 = vand.u32 65535, %v2789_v21 }
 0x1fa   : > { %2142 = vmatpush3.msra.mxu1 %v1293_v19  ;;  %v972_v2 = vand.u32 65535, %v2792_v17  ;;  %v1000_v21 = vand.u32 65535, %v2805_v40  ;;  %v986_v17 = vand.u32 65535, %v2808_v24  ;;  %v1014_v40 = vand.u32 65535, %v2821_v9 }
 0x1fb   : > { %v1028_v24 = vand.u32 65535, %v2824_v35  ;;  %v1056_v9 = vand.u32 65535, %v2837_v18  ;;  %v1042_v35 = vand.u32 65535, %v2840_v42  ;;  %v1070_v18 = vand.u32 65535, %v2853_v11 }
 0x1fc   : > { %v1084_v42 = vand.u32 65535, %v2856_v54  ;;  %v1112_v11 = vand.u32 65535, %v2869_v47  ;;  %v1098_v54 = vand.u32 65535, %v2872_v0  ;;  %v1126_v47 = vand.u32 65535, %v2885_v8 }
 0x1fd   : > { %v1140_v0 = vand.u32 65535, %v2888_v51  ;;  %v1168_v8 = vand.u32 65535, %v2901_v16  ;;  %v1154_v51 = vand.u32 65535, %v2904_v36 }
 0x229   : > { %v2969_v15 = vpop.xlane.xlu0 %752 }
 0x22a   : > { %vm754_vm3 = vcmp.eq.f32.partialorder %v2679_v49, %v2969_v15 }
 0x22b   : > { %v755_v7 = vsel %vm754_vm3, %v750_v62, inf }
 0x22c   : > { %756 = vmin.xlane.f32.xlu0 %v755_v7 }
 0x22d   : > { %v2975_v25 = vpop.xlane.xlu0 %780  ;;  %v2977_v55 = vpop.xlane.xlu1 %766 }
 0x22e   : > { %vm782_vm4 = vcmp.eq.f32.partialorder %v2691_v52, %v2975_v25  ;;  %vm768_vm5 = vcmp.eq.f32.partialorder %v2693_v1, %v2977_v55 }
 0x22f   : > { %v783_v50 = vsel %vm782_vm4, %v778_v44, inf  ;;  %v769_v49 = vsel %vm768_vm5, %v764_v43, inf  ;;  %v874_v43 = vand.u32 65535, %v2744_v37  ;;  %v902_v37 = vand.u32 65535, %v2757_v46 }
 0x230   : > { %784 = vmin.xlane.f32.xlu0 %v783_v50  ;;  %770 = vmin.xlane.f32.xlu1 %v769_v49 }
 0x231   : > { %v2985_v62 = vpop.xlane.xlu0 %808  ;;  %v2987_v26 = vpop.xlane.xlu1 %794 }
 0x232   : > { %vm810_vm6 = vcmp.eq.f32.partialorder %v2704_v6, %v2985_v62  ;;  %vm796_vm7 = vcmp.eq.f32.partialorder %v2706_v3, %v2987_v26 }
 0x233   : > { %v811_v52 = vsel %vm810_vm6, %v806_v34, inf  ;;  %v797_v1 = vsel %vm796_vm7, %v792_v38, inf }
 0x234   : > { %812 = vmin.xlane.f32.xlu0 %v811_v52  ;;  %798 = vmin.xlane.f32.xlu1 %v797_v1  ;;  %v890_v52 = vcvt.s32.f32 %v888_v20  ;;  %v876_v1 = vcvt.s32.f32 %v874_v43  ;;  %v946_v20 = vcvt.s32.f32 %v944_v57  ;;  %v932_v43 = vcvt.s32.f32 %v930_v4 }
 0x235   : > { %v2995_v7 = vpop.xlane.xlu0 %836  ;;  %v2997_v44 = vpop.xlane.xlu1 %822  ;;  %v1016_v57 = vcvt.s32.f32 %v1014_v40  ;;  %v3456_v40 = vld [vmem:[#allocation13_spill] sm:$0xff] }
 0x236   : > { %vm838_vm8 = vcmp.eq.f32.partialorder %v2720_v13, %v2995_v7  ;;  %vm824_vm9 = vcmp.eq.f32.partialorder %v2722_v14, %v2997_v44  ;;  %v862_v13 = vcvt.s32.f32 %v860_v5 }
 0x237   : > { %v839_v6 = vsel %vm838_vm8, %v834_v33, inf  ;;  %v825_v3 = vsel %vm824_vm9, %v820_v32, inf  ;;  %v904_v32 = vcvt.s32.f32 %v902_v37 }
 0x238   : > { %840 = vmin.xlane.f32.xlu0 %v839_v6  ;;  %826 = vmin.xlane.f32.xlu1 %v825_v3 }
 0x239   : > { %v3008_v50 = vpop.xlane.xlu0 %864  ;;  %v3010_v49 = vpop.xlane.xlu1 %850 }
 0x23a   : > { %vm866_vm10 = vcmp.eq.f32.partialorder %v2736_v27, %v3008_v50  ;;  %vm852_vm11 = vcmp.eq.f32.partialorder %v2738_v28, %v3010_v49  ;;  %v1292_v27 = vld [vmem:[%s3417_s2] sm:$0xff] }
 0x23b   : > { %v867_v14 = vsel %vm866_vm10, %v862_v13, inf  ;;  %v853_v31 = vsel %vm852_vm11, %v848_v60, inf  ;;  %2062 = vmatprep.subr.mxu0 %v1292_v27  ;;  %2127 = vmatprep.subr.mxu1 %v1292_v27 }
 0x23c   : > { %868 = vmin.xlane.f32.xlu0 %v867_v14  ;;  %854 = vmin.xlane.f32.xlu1 %v853_v31  ;;  %v974_v14 = vcvt.s32.f32 %v972_v2  ;;  %v960_v31 = vcvt.s32.f32 %v958_v61 }
 0x23d   : > { %v3018_v34 = vpop.xlane.xlu0 %892  ;;  %v3020_v38 = vpop.xlane.xlu1 %878  ;;  %2063 = vmatpush3.msra.mxu0 %v1292_v27  ;;  %2143 = vmatpush3.msra.mxu1 %v1292_v27 }
 0x23e   : > { %vm894_vm12 = vcmp.eq.f32.partialorder %v2752_v45, %v3018_v34  ;;  %vm880_vm13 = vcmp.eq.f32.partialorder %v2754_v53, %v3020_v38  ;;  %v918_v45 = vcvt.s32.f32 %v916_v58 }
 0x23f   : > { %v895_v28 = vsel %vm894_vm12, %v890_v52, inf  ;;  %v881_v46 = vsel %vm880_vm13, %v876_v1, inf  ;;  %v1002_v52 = vcvt.s32.f32 %v1000_v21  ;;  %v988_v1 = vcvt.s32.f32 %v986_v17 }
 0x240   : > { %896 = vmin.xlane.f32.xlu0 %v895_v28  ;;  %882 = vmin.xlane.f32.xlu1 %v881_v46  ;;  %v1030_v46 = vcvt.s32.f32 %v1028_v24 }
 0x241   : > { %v3031_v5 = vpop.xlane.xlu0 %920  ;;  %v3033_v33 = vpop.xlane.xlu1 %906 }
 0x242   : > { %vm922_vm14 = vcmp.eq.f32.partialorder %v2768_v56, %v3031_v5  ;;  %vm908_vm15 = vcmp.eq.f32.partialorder %v2770_v59, %v3033_v33 }
 0x243   : > { %v923_v53 = vsel %vm922_vm14, %v918_v45, inf  ;;  %v909_v6 = vsel %vm908_vm15, %v904_v32, inf  ;;  %v1058_v32 = vcvt.s32.f32 %v1056_v9  ;;  %v1128_v9 = vcvt.s32.f32 %v1126_v47 }
 0x244   : > { %924 = vmin.xlane.f32.xlu0 %v923_v53  ;;  %910 = vmin.xlane.f32.xlu1 %v909_v6  ;;  %v1044_v53 = vcvt.s32.f32 %v1042_v35  ;;  %v3457_v35 = vld [vmem:[#allocation14_spill] sm:$0xff] }
 0x245   : > { %v3041_v3 = vpop.xlane.xlu0 %948  ;;  %v3043_v19 = vpop.xlane.xlu1 %934 }
 0x246   : > { %vm950_vm1 = vcmp.eq.f32.partialorder %v2784_v10, %v3041_v3  ;;  %vm936_vm2 = vcmp.eq.f32.partialorder %v2786_v12, %v3043_v19 }
 0x247   : > { %v951_v56 = vsel %vm950_vm1, %v946_v20, inf  ;;  %v937_v59 = vsel %vm936_vm2, %v932_v43, inf  ;;  %v1086_v20 = vcvt.s32.f32 %v1084_v42  ;;  %v1072_v43 = vcvt.s32.f32 %v1070_v18 }
 0x248   : > { %952 = vmin.xlane.f32.xlu0 %v951_v56  ;;  %938 = vmin.xlane.f32.xlu1 %v937_v59  ;;  %v3453_v56 = vld [vmem:[#allocation10_spill] sm:$0xff]  ;;  %v1170_v18 = vcvt.s32.f32 %v1168_v8  ;;  %v1156_v42 = vcvt.s32.f32 %v1154_v51  ;;  %v3462_v51 = vld [vmem:[#allocation8_spill] sm:$0xff] }
 0x249   : > { %v3051_v13 = vpop.xlane.xlu0 %976  ;;  %v3053_v60 = vpop.xlane.xlu1 %962 }
 0x24a   : > { %vm978_vm3 = vcmp.eq.f32.partialorder %v2800_v39, %v3051_v13  ;;  %vm964_vm4 = vcmp.eq.f32.partialorder %v2802_v23, %v3053_v60 }
 0x24b   : > { %v979_v10 = vsel %vm978_vm3, %v974_v14, inf  ;;  %v965_v12 = vsel %vm964_vm4, %v960_v31, inf  ;;  %v1114_v31 = vcvt.s32.f32 %v1112_v11  ;;  %v3461_v11 = vld [vmem:[#allocation18_spill] sm:$0xff] }
 0x24c   : > { %980 = vmin.xlane.f32.xlu0 %v979_v10  ;;  %966 = vmin.xlane.f32.xlu1 %v965_v12  ;;  %v1100_v10 = vcvt.s32.f32 %v1098_v54  ;;  %v3455_v12 = vld [vmem:[#allocation12_spill] sm:$0xff] }
 0x24d   : > { %v3061_v37 = vpop.xlane.xlu0 %1004  ;;  %v3063_v58 = vpop.xlane.xlu1 %990 }
 0x24e   : > { %vm1006_vm5 = vcmp.eq.f32.partialorder %v2816_v63, %v3061_v37  ;;  %vm992_vm6 = vcmp.eq.f32.partialorder %v2818_v30, %v3063_v58 }
 0x24f   : > { %v1007_v39 = vsel %vm1006_vm5, %v1002_v52, inf  ;;  %v993_v23 = vsel %vm992_vm6, %v988_v1, inf }
 0x250   : > { %1008 = vmin.xlane.f32.xlu0 %v1007_v39  ;;  %994 = vmin.xlane.f32.xlu1 %v993_v23  ;;  %v1142_v23 = vcvt.s32.f32 %v1140_v0 }
 0x251   : > { %v3071_v27 = vpop.xlane.xlu0 %1032  ;;  %v3073_v28 = vpop.xlane.xlu1 %1018 }
 0x252   : > { %vm1034_vm7 = vcmp.eq.f32.partialorder %v2832_v22, %v3071_v27  ;;  %vm1020_vm8 = vcmp.eq.f32.partialorder %v2834_v41, %v3073_v28  ;;  %v3452_v22 = vld [vmem:[#allocation9_spill] sm:$0xff] }
 0x253   : > { %v1035_v63 = vsel %vm1034_vm7, %v1030_v46, inf  ;;  %v1021_v30 = vsel %vm1020_vm8, %v1016_v57, inf }
 0x254   : > { %1036 = vmin.xlane.f32.xlu0 %v1035_v63  ;;  %1022 = vmin.xlane.f32.xlu1 %v1021_v30  ;;  %v3458_v63 = vld [vmem:[#allocation17_spill] sm:$0xff] }
 0x255   : > { %v3081_v4 = vpop.xlane.xlu0 %1060  ;;  %v3083_v45 = vpop.xlane.xlu1 %1046  ;;  %v1182_v16 = vand.u32 65535, %v3458_v63 }
 0x256   : > { %vm1062_vm9 = vcmp.eq.f32.partialorder %v2848_v29, %v3081_v4  ;;  %vm1048_vm10 = vcmp.eq.f32.partialorder %v3452_v22, %v3083_v45  ;;  %v3454_v29 = vld [vmem:[#allocation11_spill] sm:$0xff] }
 0x257   : > { %v1063_v41 = vsel %vm1062_vm9, %v1058_v32, inf  ;;  %v1049_v6 = vsel %vm1048_vm10, %v1044_v53, inf  ;;  %v3459_v32 = vld [vmem:[#allocation15_spill] sm:$0xff] }
 0x258   : > { %1064 = vmin.xlane.f32.xlu0 %v1063_v41  ;;  %1050 = vmin.xlane.f32.xlu1 %v1049_v6  ;;  %v1184_v6 = vcvt.s32.f32 %v1182_v16 }
 0x259   : > { %v3091_v61 = vpop.xlane.xlu0 %1088  ;;  %v3093_v2 = vpop.xlane.xlu1 %1074 }
 0x25a   : > { %vm1090_vm11 = vcmp.eq.f32.partialorder %v3453_v56, %v3091_v61  ;;  %vm1076_vm12 = vcmp.eq.f32.partialorder %v3454_v29, %v3093_v2 }
 0x25b   : > { %v1091_v59 = vsel %vm1090_vm11, %v1086_v20, inf  ;;  %v1077_v21 = vsel %vm1076_vm12, %v1072_v43, inf  ;;  %v759_v20 = vcvt.f32.s32 %v2969_v15  ;;  %v787_v43 = vcvt.f32.s32 %v2975_v25 }
 0x25c   : > { %1092 = vmin.xlane.f32.xlu0 %v1091_v59  ;;  %1078 = vmin.xlane.f32.xlu1 %v1077_v21  ;;  %v773_v59 = vcvt.f32.s32 %v2977_v55  ;;  %v2330_v15 = vmov 1.0  }
 0x25d   : > { %v3101_v17 = vpop.xlane.xlu0 %1116  ;;  %v3103_v14 = vpop.xlane.xlu1 %1102  ;;  %v760_v29 = vshll.u32 %v759_v20, 16  ;;  %v788_v0 = vshll.u32 %v787_v43, 16 }
 0x25e   : > { %vm1118_vm13 = vcmp.eq.f32.partialorder %v3455_v12, %v3101_v17  ;;  %vm1104_vm14 = vcmp.eq.f32.partialorder %v3456_v40, %v3103_v14 }
 0x25f   : > { %v1119_v24 = vsel %vm1118_vm13, %v1114_v31, inf  ;;  %v1105_v52 = vsel %vm1104_vm14, %v1100_v10, inf  ;;  %v815_v31 = vcvt.f32.s32 %v2985_v62  ;;  %v801_v10 = vcvt.f32.s32 %v2987_v26 }
 0x260   : > { %1120 = vmin.xlane.f32.xlu0 %v1119_v24  ;;  %1106 = vmin.xlane.f32.xlu1 %v1105_v52  ;;  %v774_v24 = vshll.u32 %v773_v59, 16  ;;  %v829_v62 = vcvt.f32.s32 %v2997_v44  ;;  %v857_v44 = vcvt.f32.s32 %v3010_v49  ;;  %v885_v49 = vcvt.f32.s32 %v3020_v38 }
 0x261   : > { %v3111_v1 = vpop.xlane.xlu0 %1144  ;;  %v3113_v39 = vpop.xlane.xlu1 %1130  ;;  %v816_v55 = vshll.u32 %v815_v31, 16  ;;  %v913_v38 = vcvt.f32.s32 %v3033_v33  ;;  %v941_v33 = vcvt.f32.s32 %v3043_v19  ;;  %v969_v19 = vcvt.f32.s32 %v3053_v60 }
 0x262   : > { %vm1146_vm15 = vcmp.eq.f32.partialorder %v2896_v48, %v3111_v1  ;;  %vm1132_vm1 = vcmp.eq.f32.partialorder %v3457_v35, %v3113_v39  ;;  %v3460_v48 = vld [vmem:[#allocation16_spill] sm:$0xff]  ;;  %v843_v35 = vcvt.f32.s32 %v2995_v7  ;;  %v871_v7 = vcvt.f32.s32 %v3008_v50 }
 0x263   : > { %v1147_v46 = vsel %vm1146_vm15, %v1142_v23, inf  ;;  %v1133_v57 = vsel %vm1132_vm1, %v1128_v9, inf  ;;  %v802_v9 = vshll.u32 %v801_v10, 16  ;;  %v858_v43 = vshll.u32 %v857_v44, 16 }
 0x264   : > { %1148 = vmin.xlane.f32.xlu0 %v1147_v46  ;;  %1134 = vmin.xlane.f32.xlu1 %v1133_v57  ;;  %v872_v20 = vshll.u32 %v871_v7, 16  ;;  %v899_v50 = vcvt.f32.s32 %v3018_v34  ;;  %v886_v10 = vshll.u32 %v885_v49, 16  ;;  %v927_v34 = vcvt.f32.s32 %v3031_v5 }
 0x265   : > { %v3120_v30 = vpop.xlane.xlu0 %1172  ;;  %v3122_v36 = vpop.xlane.xlu1 %1158  ;;  %v955_v5 = vcvt.f32.s32 %v3041_v3  ;;  %v983_v3 = vcvt.f32.s32 %v3051_v13  ;;  %v1011_v13 = vcvt.f32.s32 %v3061_v37  ;;  %v997_v60 = vcvt.f32.s32 %v3063_v58 }
 0x266   : > { %vm1174_vm2 = vcmp.eq.f32.partialorder %v3459_v32, %v3120_v30  ;;  %vm1160_vm3 = vcmp.eq.f32.partialorder %v3460_v48, %v3122_v36  ;;  %v830_v32 = vshll.u32 %v829_v62, 16  ;;  %v900_v31 = vshll.u32 %v899_v50, 16 }
 0x267   : > { %v1175_v53 = vsel %vm1174_vm2, %v1170_v18, inf  ;;  %v1161_v22 = vsel %vm1160_vm3, %v1156_v42, inf  ;;  %v844_v42 = vshll.u32 %v843_v35, 16  ;;  %v1012_v49 = vshll.u32 %v1011_v13, 16 }
 0x268   : > { %1176 = vmin.xlane.f32.xlu0 %v1175_v53  ;;  %1162 = vmin.xlane.f32.xlu1 %v1161_v22  ;;  %v1039_v37 = vcvt.f32.s32 %v3071_v27  ;;  %v1025_v58 = vcvt.f32.s32 %v3073_v28  ;;  %v1067_v27 = vcvt.f32.s32 %v3081_v4  ;;  %v1053_v28 = vcvt.f32.s32 %v3083_v45 }
 0x269   : > { %v3128_v41 = vpop.xlane.xlu1 %1186  ;;  %v1095_v4 = vcvt.f32.s32 %v3091_v61  ;;  %v1081_v45 = vcvt.f32.s32 %v3093_v2  ;;  %v1123_v61 = vcvt.f32.s32 %v3101_v17  ;;  %v1109_v2 = vcvt.f32.s32 %v3103_v14 }
 0x26a   : > { %vm1188_vm4 = vcmp.eq.f32.partialorder %v3461_v11, %v3128_v41  ;;  %v1151_v17 = vcvt.f32.s32 %v3111_v1  ;;  %v1137_v14 = vcvt.f32.s32 %v3113_v39  ;;  %v1179_v1 = vcvt.f32.s32 %v3120_v30 }
 0x26b   : > { %v1189_v54 = vsel %vm1188_vm4, %v1184_v6, inf  ;;  %v1165_v39 = vcvt.f32.s32 %v3122_v36  ;;  %v1193_v30 = vcvt.f32.s32 %v3128_v41 }
 0x26c   : > { %1190 = vmin.xlane.f32.xlu1 %v1189_v54 }
 0x2b5   : > { %v757_v56 = vpop.xlane.xlu0 %756 }
 0x2b6   : > { %v758_v21 = vcvt.f32.s32 %v757_v56 }
 0x2b8   : > { %v761_v47 = vadd.s32 %v760_v29, %v758_v21 }
 0x2b9   : > { %v785_v12 = vpop.xlane.xlu0 %784  ;;  %v771_v40 = vpop.xlane.xlu1 %770 }
 0x2ba   : > { %v786_v52 = vcvt.f32.s32 %v785_v12  ;;  %v772_v8 = vcvt.f32.s32 %v771_v40  ;;  %vm1196_vm5 = vcmp.eq.s32.totalorder %v761_v47, %v3462_v51 }
 0x2bb   : > { %2064 = vmatprep.mubr.msk.f32.mxu0 %vm1196_vm5, %v2330_v15 }
 0x2bc   : > { %v789_v25 = vadd.s32 %v788_v0, %v786_v52  ;;  %v775_v23 = vadd.s32 %v774_v24, %v772_v8 }
 0x2bd   : > { %v813_v46 = vpop.xlane.xlu0 %812  ;;  %v799_v26 = vpop.xlane.xlu1 %798 }
 0x2be   : > { %vm1197_vm6 = vcmp.eq.s32.totalorder %v775_v23, %v3462_v51  ;;  %v814_v57 = vcvt.f32.s32 %v813_v46  ;;  %v800_v63 = vcvt.f32.s32 %v799_v26  ;;  %vm1198_vm7 = vcmp.eq.s32.totalorder %v789_v25, %v3462_v51 }
 0x2bf   : > { %2065 = vmatmul.mubr.msk.f32.vlgmr.msra.gmra.mxu0 %vm1197_vm6, %v2330_v15  ;;  %v928_v23 = vshll.u32 %v927_v34, 16  ;;  %v1026_v34 = vshll.u32 %v1025_v58, 16 }
 0x2c0   : > { %v803_v16 = vadd.s32 %v802_v9, %v800_v63  ;;  %2067 = vmatprep.mubr.msk.f32.mxu0 %vm1198_vm7, %v2330_v15  ;;  %v817_v18 = vadd.s32 %v816_v55, %v814_v57  ;;  %v914_v55 = vshll.u32 %v913_v38, 16  ;;  %v956_v63 = vshll.u32 %v955_v5, 16 }
 0x2c1   : > { %v841_v48 = vpop.xlane.xlu0 %840  ;;  %v827_v53 = vpop.xlane.xlu1 %826 }
 0x2c2   : > { %v842_v22 = vcvt.f32.s32 %v841_v48  ;;  %v828_v6 = vcvt.f32.s32 %v827_v53  ;;  %vm1199_vm8 = vcmp.eq.s32.totalorder %v803_v16, %v3462_v51  ;;  %vm1200_vm9 = vcmp.eq.s32.totalorder %v817_v18, %v3462_v51 }
 0x2c3   : > { %2068 = vmatmul.mubr.msk.f32.gmra.mxu0 %vm1199_vm8, %v2330_v15  ;;  %2070 = vmatprep.mubr.msk.f32.mxu1 %vm1200_vm9, %v2330_v15  ;;  %v942_v16 = vshll.u32 %v941_v33, 16  ;;  %v984_v53 = vshll.u32 %v983_v3, 16 }
 0x2c4   : > { %v845_v11 = vadd.s32 %v844_v42, %v842_v22  ;;  %v831_v54 = vadd.s32 %v830_v32, %v828_v6  ;;  %v970_v22 = vshll.u32 %v969_v19, 16 }
 0x2c5   : > { %v869_v56 = vpop.xlane.xlu0 %868  ;;  %v855_v29 = vpop.xlane.xlu1 %854 }
 0x2c6   : > { %v870_v59 = vcvt.f32.s32 %v869_v56  ;;  %v856_v21 = vcvt.f32.s32 %v855_v29  ;;  %vm1201_vm10 = vcmp.eq.s32.totalorder %v831_v54, %v3462_v51  ;;  %vm1202_vm11 = vcmp.eq.s32.totalorder %v845_v11, %v3462_v51 }
 0x2c7   : > { %2071 = vmatmul.mubr.msk.f32.vlgmr.msra.gmra.mxu1 %vm1201_vm10, %v2330_v15  ;;  %v998_v56 = vshll.u32 %v997_v60, 16  ;;  %v1152_v60 = vshll.u32 %v1151_v17, 16 }
 0x2c8   : > { %v873_v47 = vadd.s32 %v872_v20, %v870_v59  ;;  %v859_v0 = vadd.s32 %v858_v43, %v856_v21  ;;  %2073 = vmatprep.mubr.msk.f32.mxu1 %vm1202_vm11, %v2330_v15 }
 0x2c9   : > { %v897_v12 = vpop.xlane.xlu0 %896  ;;  %v883_v40 = vpop.xlane.xlu1 %882 }
 0x2ca   : > { %v898_v24 = vcvt.f32.s32 %v897_v12  ;;  %v884_v52 = vcvt.f32.s32 %v883_v40  ;;  %vm1203_vm12 = vcmp.eq.s32.totalorder %v859_v0, %v3462_v51  ;;  %vm1204_vm13 = vcmp.eq.s32.totalorder %v873_v47, %v3462_v51 }
 0x2cb   : > { %2074 = vmatmul.mubr.msk.f32.gmra.mxu1 %vm1203_vm12, %v2330_v15 }
 0x2cc   : > { %v901_v8 = vadd.s32 %v900_v31, %v898_v24  ;;  %v887_v25 = vadd.s32 %v886_v10, %v884_v52  ;;  %2076 = vmatprep.mubr.msk.f32.mxu1 %vm1204_vm13, %v2330_v15  ;;  %v1040_v10 = vshll.u32 %v1039_v37, 16  ;;  %v1166_v37 = vshll.u32 %v1165_v39, 16 }
 0x2cd   : > { %v925_v9 = vpop.xlane.xlu0 %924  ;;  %v911_v35 = vpop.xlane.xlu1 %910 }
 0x2ce   : > { %v926_v62 = vcvt.f32.s32 %v925_v9  ;;  %v912_v46 = vcvt.f32.s32 %v911_v35  ;;  %vm1205_vm14 = vcmp.eq.s32.totalorder %v887_v25, %v3462_v51  ;;  %vm1206_vm15 = vcmp.eq.s32.totalorder %v901_v8, %v3462_v51 }
 0x2cf   : > { %2077 = vmatmul.mubr.msk.f32.gmra.mxu1 %vm1205_vm14, %v2330_v15  ;;  %v1068_v25 = vshll.u32 %v1067_v27, 16  ;;  %v2201_v27 = vld [vmem:[%s2467_s28 + $0x8] sm:$0xff] }
 0x2d0   : > { %v929_v26 = vadd.s32 %v928_v23, %v926_v62  ;;  %v915_v57 = vadd.s32 %v914_v55, %v912_v46  ;;  %2079 = vmatprep.mubr.msk.f32.mxu1 %vm1206_vm15, %v2330_v15  ;;  %v1054_v23 = vshll.u32 %v1053_v28, 16  ;;  %v1096_v46 = vshll.u32 %v1095_v4, 16  ;;  %v2204_v4 = vld [vmem:[%s2467_s28 + $0x10] sm:$0xff] }
 0x2d1   : > { %v953_v18 = vpop.xlane.xlu0 %952  ;;  %v939_v42 = vpop.xlane.xlu1 %938 }
 0x2d2   : > { %v954_v32 = vcvt.f32.s32 %v953_v18  ;;  %v940_v7 = vcvt.f32.s32 %v939_v42  ;;  %vm1207_vm1 = vcmp.eq.s32.totalorder %v915_v57, %v3462_v51  ;;  %vm1208_vm2 = vcmp.eq.s32.totalorder %v929_v26, %v3462_v51 }
 0x2d3   : > { %2080 = vmatmul.mubr.msk.f32.gmra.mxu1 %vm1207_vm1, %v2330_v15  ;;  %v1082_v26 = vshll.u32 %v1081_v45, 16  ;;  %v1124_v42 = vshll.u32 %v1123_v61, 16 }
 0x2d4   : > { %v957_v44 = vadd.s32 %v956_v63, %v954_v32  ;;  %v943_v48 = vadd.s32 %v942_v16, %v940_v7  ;;  %2082 = vmatprep.mubr.msk.f32.mxu1 %vm1208_vm2, %v2330_v15  ;;  %v1110_v32 = vshll.u32 %v1109_v2, 16  ;;  %v2206_v2 = vld [vmem:[%s2467_s28 + $0x20] sm:$0xff] }
 0x2d5   : > { %v981_v6 = vpop.xlane.xlu0 %980  ;;  %v967_v11 = vpop.xlane.xlu1 %966 }
 0x2d6   : > { %v982_v54 = vcvt.f32.s32 %v981_v6  ;;  %v968_v20 = vcvt.f32.s32 %v967_v11  ;;  %vm1209_vm3 = vcmp.eq.s32.totalorder %v943_v48, %v3462_v51  ;;  %vm1210_vm4 = vcmp.eq.s32.totalorder %v957_v44, %v3462_v51 }
 0x2d7   : > { %2083 = vmatmul.mubr.msk.f32.gmra.mxu1 %vm1209_vm3, %v2330_v15  ;;  %v1138_v6 = vshll.u32 %v1137_v14, 16 }
 0x2d8   : > { %v985_v43 = vadd.s32 %v984_v53, %v982_v54  ;;  %v971_v50 = vadd.s32 %v970_v22, %v968_v20  ;;  %2085 = vmatprep.mubr.msk.f32.mxu1 %vm1210_vm4, %v2330_v15 }
 0x2d9   : > { %v1009_v29 = vpop.xlane.xlu0 %1008  ;;  %v995_v59 = vpop.xlane.xlu1 %994 }
 0x2da   : > { %v1010_v21 = vcvt.f32.s32 %v1009_v29  ;;  %v996_v47 = vcvt.f32.s32 %v995_v59  ;;  %vm1211_vm5 = vcmp.eq.s32.totalorder %v971_v50, %v3462_v51  ;;  %vm1212_vm6 = vcmp.eq.s32.totalorder %v985_v43, %v3462_v51 }
 0x2db   : > { %2086 = vmatmul.mubr.msk.f32.gmra.mxu1 %vm1211_vm5, %v2330_v15 }
 0x2dc   : > { %v1013_v0 = vadd.s32 %v1012_v49, %v1010_v21  ;;  %v999_v31 = vadd.s32 %v998_v56, %v996_v47  ;;  %2088 = vmatprep.mubr.msk.f32.mxu1 %vm1212_vm6, %v2330_v15  ;;  %v1180_v56 = vshll.u32 %v1179_v1, 16  ;;  %v2209_v1 = vld [vmem:[%s2467_s28 + $0x48] sm:$0xff] }
 0x2dd   : > { %v1037_v38 = vpop.xlane.xlu0 %1036  ;;  %v1023_v12 = vpop.xlane.xlu1 %1022 }
 0x2de   : > { %v1038_v40 = vcvt.f32.s32 %v1037_v38  ;;  %v1024_v24 = vcvt.f32.s32 %v1023_v12  ;;  %vm1213_vm7 = vcmp.eq.s32.totalorder %v999_v31, %v3462_v51  ;;  %vm1214_vm8 = vcmp.eq.s32.totalorder %v1013_v0, %v3462_v51  ;;  %v2202_v12 = vld [vmem:[%s2467_s28] sm:$0xff] }
 0x2df   : > { %2089 = vmatmul.mubr.msk.f32.gmra.mxu1 %vm1213_vm7, %v2330_v15  ;;  %v1194_v31 = vshll.u32 %v1193_v30, 16 }
 0x2e0   : > { %v1041_v52 = vadd.s32 %v1040_v10, %v1038_v40  ;;  %v1027_v8 = vadd.s32 %v1026_v34, %v1024_v24  ;;  %2091 = vmatprep.mubr.msk.f32.mxu1 %vm1214_vm8, %v2330_v15 }
 0x2e1   : > { %v1065_v55 = vpop.xlane.xlu0 %1064  ;;  %v1051_v5 = vpop.xlane.xlu1 %1050 }
 0x2e2   : > { %v1066_v33 = vcvt.f32.s32 %v1065_v55  ;;  %v1052_v9 = vcvt.f32.s32 %v1051_v5  ;;  %vm1215_vm9 = vcmp.eq.s32.totalorder %v1027_v8, %v3462_v51  ;;  %vm1216_vm10 = vcmp.eq.s32.totalorder %v1041_v52, %v3462_v51  ;;  %v2203_v52 = vld [vmem:[%s2467_s28 + $0x18] sm:$0xff] }
 0x2e3   : > { %2092 = vmatmul.mubr.msk.f32.gmra.mxu1 %vm1215_vm9, %v2330_v15 }
 0x2e4   : > { %v1069_v35 = vadd.s32 %v1068_v25, %v1066_v33  ;;  %v1055_v62 = vadd.s32 %v1054_v23, %v1052_v9  ;;  %2094 = vmatprep.mubr.msk.f32.mxu1 %vm1216_vm10, %v2330_v15 }
 0x2e5   : > { %v1093_v57 = vpop.xlane.xlu0 %1092  ;;  %v1079_v63 = vpop.xlane.xlu1 %1078 }
 0x2e6   : > { %v1094_v16 = vcvt.f32.s32 %v1093_v57  ;;  %v1080_v3 = vcvt.f32.s32 %v1079_v63  ;;  %vm1217_vm11 = vcmp.eq.s32.totalorder %v1055_v62, %v3462_v51  ;;  %vm1218_vm12 = vcmp.eq.s32.totalorder %v1069_v35, %v3462_v51  ;;  %v2205_v35 = vld [vmem:[%s2467_s28 + $0x28] sm:$0xff] }
 0x2e7   : > { %2095 = vmatmul.mubr.msk.f32.gmra.mxu1 %vm1217_vm11, %v2330_v15 }
 0x2e8   : > { %v1097_v19 = vadd.s32 %v1096_v46, %v1094_v16  ;;  %v1083_v18 = vadd.s32 %v1082_v26, %v1080_v3  ;;  %2097 = vmatprep.mubr.msk.f32.mxu1 %vm1218_vm12, %v2330_v15 }
 0x2e9   : > { %v1121_v7 = vpop.xlane.xlu0 %1120  ;;  %v1107_v44 = vpop.xlane.xlu1 %1106 }
 0x2ea   : > { %v1122_v48 = vcvt.f32.s32 %v1121_v7  ;;  %v1108_v53 = vcvt.f32.s32 %v1107_v44  ;;  %vm1219_vm13 = vcmp.eq.s32.totalorder %v1083_v18, %v3462_v51  ;;  %vm1220_vm14 = vcmp.eq.s32.totalorder %v1097_v19, %v3462_v51  ;;  %v2208_v44 = vld [vmem:[%s2467_s28 + $0x30] sm:$0xff] }
 0x2eb   : > { %2098 = vmatmul.mubr.msk.f32.gmra.mxu1 %vm1219_vm13, %v2330_v15 }
 0x2ec   : > { %v1125_v22 = vadd.s32 %v1124_v42, %v1122_v48  ;;  %v1111_v13 = vadd.s32 %v1110_v32, %v1108_v53  ;;  %2100 = vmatprep.mubr.msk.f32.mxu1 %vm1220_vm14, %v2330_v15  ;;  %v2207_v42 = vld [vmem:[%s2467_s28 + $0x38] sm:$0xff] }
 0x2ed   : > { %v1149_v11 = vpop.xlane.xlu0 %1148  ;;  %v1135_v54 = vpop.xlane.xlu1 %1134 }
 0x2ee   : > { %v1150_v20 = vcvt.f32.s32 %v1149_v11  ;;  %v1136_v43 = vcvt.f32.s32 %v1135_v54  ;;  %vm1221_vm15 = vcmp.eq.s32.totalorder %v1111_v13, %v3462_v51  ;;  %vm1222_vm1 = vcmp.eq.s32.totalorder %v1125_v22, %v3462_v51 }
 0x2ef   : > { %2101 = vmatmul.mubr.msk.f32.gmra.mxu1 %vm1221_vm15, %v2330_v15 }
 0x2f0   : > { %v1153_v50 = vadd.s32 %v1152_v60, %v1150_v20  ;;  %v1139_v49 = vadd.s32 %v1138_v6, %v1136_v43  ;;  %2103 = vmatprep.mubr.msk.f32.mxu1 %vm1222_vm1, %v2330_v15  ;;  %v2210_v43 = vld [vmem:[%s2467_s28 + $0x40] sm:$0xff] }
 0x2f1   : > { %v1177_v58 = vpop.xlane.xlu0 %1176  ;;  %v1163_v36 = vpop.xlane.xlu1 %1162 }
 0x2f2   : > { %v1178_v29 = vcvt.f32.s32 %v1177_v58  ;;  %v1164_v59 = vcvt.f32.s32 %v1163_v36  ;;  %vm1223_vm2 = vcmp.eq.s32.totalorder %v1139_v49, %v3462_v51  ;;  %vm1224_vm3 = vcmp.eq.s32.totalorder %v1153_v50, %v3462_v51  ;;  %v2211_v36 = vld [vmem:[%s2467_s28 + $0x58] sm:$0xff] }
 0x2f3   : > { %2104 = vmatmul.mubr.msk.f32.gmra.mxu1 %vm1223_vm2, %v2330_v15 }
 0x2f4   : > { %v1181_v21 = vadd.s32 %v1180_v56, %v1178_v29  ;;  %v1167_v47 = vadd.s32 %v1166_v37, %v1164_v59  ;;  %2106 = vmatprep.mubr.msk.f32.mxu1 %vm1224_vm3, %v2330_v15 }
 0x2f5   : > { %v1191_v0 = vpop.xlane.xlu1 %1190 }
 0x2f6   : > { %v1192_v41 = vcvt.f32.s32 %v1191_v0  ;;  %vm1225_vm4 = vcmp.eq.s32.totalorder %v1167_v47, %v3462_v51  ;;  %vm1226_vm5 = vcmp.eq.s32.totalorder %v1181_v21, %v3462_v51  ;;  %v2212_v0 = vld [vmem:[%s2467_s28 + $0x50] sm:$0xff] }
 0x2f7   : > { %2107 = vmatmul.mubr.msk.f32.gmra.mxu1 %vm1225_vm4, %v2330_v15 }
 0x2f8   : > { %v1195_v10 = vadd.s32 %v1194_v31, %v1192_v41  ;;  %2109 = vmatprep.mubr.msk.f32.mxu1 %vm1226_vm5, %v2330_v15 }
 0x2fa   : > { %vm1227_vm6 = vcmp.eq.s32.totalorder %v1195_v10, %v3462_v51 }
 0x2fb   : > { %2110 = vmatmul.mubr.msk.f32.gmra.mxu1 %vm1227_vm6, %v2330_v15 }
 0x37f   : > { %v2066_v34 = vpop.f32.mrf.mxu0 }
 0x380   : > { %1534 = vst.msk [vmem:[%s3230_s16 + $0x8] sm:$0xff] %vm338_vm0, %v2066_v34  ;;  %v1566_v28 = vsub.f32 %v2066_v34, %v2201_v27 }
 0x381   : > { %v1374_v38 = vpop.f32.mrf.mxu0 }
 0x382   : > { %1533 = vst.msk [vmem:[%s3230_s16] sm:$0xff] %vm338_vm0, %v1374_v38  ;;  %v1565_v51 = vsub.f32 %v1374_v38, %v2202_v12  ;;  %v1598_v40 = vmul.f32 %v1566_v28, %v1566_v28  ;;  %v2213_v38 = vld [vmem:[%s2467_s28 + $0x68] sm:$0xff] }
 0x383   : > { %v2069_v15 = vpop.f32.mrf.mxu0 }
 0x384   : > { %v1597_v24 = vmul.f32 %v1565_v51, %v1565_v51  ;;  %1536 = vst.msk [vmem:[%s3230_s16 + $0x18] sm:$0xff] %vm338_vm0, %v2069_v15  ;;  %v1568_v8 = vsub.f32 %v2069_v15, %v2203_v52  ;;  %v1630_v5 = vsel %vm338_vm0, %v1598_v40, 0.0 }
 0x385   : > { %v1384_v25 = vpop.f32.mrf.mxu0 }
 0x386   : > { %v1629_v23 = vsel %vm338_vm0, %v1597_v24, 0.0  ;;  %1535 = vst.msk [vmem:[%s3230_s16 + $0x10] sm:$0xff] %vm338_vm0, %v1384_v25  ;;  %v1567_v45 = vsub.f32 %v1384_v25, %v2204_v4  ;;  %v1600_v33 = vmul.f32 %v1568_v8, %v1568_v8  ;;  %v2214_v24 = vld [vmem:[%s2467_s28 + $0x60] sm:$0xff] }
 0x387   : > { %v2072_v55 = vpop.f32.mrf.mxu1  ;;  %v1631_v46 = vadd.f32 %v1630_v5, %v1629_v23 }
 0x388   : > { %v1599_v9 = vmul.f32 %v1567_v45, %v1567_v45  ;;  %1538 = vst.msk [vmem:[%s3230_s16 + $0x28] sm:$0xff] %vm338_vm0, %v2072_v55  ;;  %v1570_v62 = vsub.f32 %v2072_v55, %v2205_v35  ;;  %v1634_v3 = vsel %vm338_vm0, %v1600_v33, 0.0  ;;  %v2215_v55 = vld [vmem:[%s2467_s28 + $0x78] sm:$0xff] }
 0x389   : > { %v1394_v26 = vpop.f32.mrf.mxu1 }
 0x38a   : > { %v1632_v61 = vsel %vm338_vm0, %v1599_v9, 0.0  ;;  %1537 = vst.msk [vmem:[%s3230_s16 + $0x20] sm:$0xff] %vm338_vm0, %v1394_v26  ;;  %v1569_v57 = vsub.f32 %v1394_v26, %v2206_v2  ;;  %v1602_v19 = vmul.f32 %v1570_v62, %v1570_v62  ;;  %v2216_v62 = vld [vmem:[%s2467_s28 + $0x70] sm:$0xff] }
 0x38b   : > { %v1633_v63 = vadd.f32 %v1632_v61, %v1631_v46  ;;  %v2075_v16 = vpop.f32.mrf.mxu1 }
 0x38c   : > { %v1601_v18 = vmul.f32 %v1569_v57, %v1569_v57  ;;  %1540 = vst.msk [vmem:[%s3230_s16 + $0x38] sm:$0xff] %vm338_vm0, %v2075_v16  ;;  %v1572_v32 = vsub.f32 %v2075_v16, %v2207_v42  ;;  %v1638_v13 = vsel %vm338_vm0, %v1602_v19, 0.0  ;;  %v2217_v16 = vld [vmem:[%s2467_s28 + $0x88] sm:$0xff] }
 0x38d   : > { %v1635_v17 = vadd.f32 %v1634_v3, %v1633_v63  ;;  %v1404_v14 = vpop.f32.mrf.mxu1 }
 0x38e   : > { %v1636_v7 = vsel %vm338_vm0, %v1601_v18, 0.0  ;;  %1539 = vst.msk [vmem:[%s3230_s16 + $0x30] sm:$0xff] %vm338_vm0, %v1404_v14  ;;  %v1571_v48 = vsub.f32 %v1404_v14, %v2208_v44  ;;  %v1604_v60 = vmul.f32 %v1572_v32, %v1572_v32  ;;  %v2218_v32 = vld [vmem:[%s2467_s28 + $0x80] sm:$0xff] }
 0x38f   : > { %v1637_v53 = vadd.f32 %v1636_v7, %v1635_v17  ;;  %v2078_v22 = vpop.f32.mrf.mxu1 }
 0x390   : > { %v1603_v6 = vmul.f32 %v1571_v48, %v1571_v48  ;;  %1542 = vst.msk [vmem:[%s3230_s16 + $0x48] sm:$0xff] %vm338_vm0, %v2078_v22  ;;  %v1574_v39 = vsub.f32 %v2078_v22, %v2209_v1  ;;  %v1642_v37 = vsel %vm338_vm0, %v1604_v60, 0.0  ;;  %v2219_v22 = vld [vmem:[%s2467_s28 + $0x98] sm:$0xff] }
 0x391   : > { %v1639_v11 = vadd.f32 %v1638_v13, %v1637_v53  ;;  %v1414_v54 = vpop.f32.mrf.mxu1 }
 0x392   : > { %v1640_v20 = vsel %vm338_vm0, %v1603_v6, 0.0  ;;  %1541 = vst.msk [vmem:[%s3230_s16 + $0x40] sm:$0xff] %vm338_vm0, %v1414_v54  ;;  %v1573_v50 = vsub.f32 %v1414_v54, %v2210_v43  ;;  %v1606_v30 = vmul.f32 %v1574_v39, %v1574_v39  ;;  %v2220_v39 = vld [vmem:[%s2467_s28 + $0x90] sm:$0xff] }
 0x393   : > { %v1641_v49 = vadd.f32 %v1640_v20, %v1639_v11  ;;  %v2081_v56 = vpop.f32.mrf.mxu1 }
 0x394   : > { %v1605_v58 = vmul.f32 %v1573_v50, %v1573_v50  ;;  %1544 = vst.msk [vmem:[%s3230_s16 + $0x58] sm:$0xff] %vm338_vm0, %v2081_v56  ;;  %v1576_v29 = vsub.f32 %v2081_v56, %v2211_v36  ;;  %v1646_v34 = vsel %vm338_vm0, %v1606_v30, 0.0  ;;  %v2221_v56 = vld [vmem:[%s2467_s28 + $0xa8] sm:$0xff] }
 0x395   : > { %v1643_v59 = vadd.f32 %v1642_v37, %v1641_v49  ;;  %v1424_v21 = vpop.f32.mrf.mxu1 }
 0x396   : > { %v1644_v47 = vsel %vm338_vm0, %v1605_v58, 0.0  ;;  %1543 = vst.msk [vmem:[%s3230_s16 + $0x50] sm:$0xff] %vm338_vm0, %v1424_v21  ;;  %v1575_v31 = vsub.f32 %v1424_v21, %v2212_v0  ;;  %v1608_v27 = vmul.f32 %v1576_v29, %v1576_v29  ;;  %v2222_v29 = vld [vmem:[%s2467_s28 + $0xa0] sm:$0xff] }
 0x397   : > { %v1645_v41 = vadd.f32 %v1644_v47, %v1643_v59  ;;  %v2084_v10 = vpop.f32.mrf.mxu1 }
 0x398   : > { %v1607_v28 = vmul.f32 %v1575_v31, %v1575_v31  ;;  %1546 = vst.msk [vmem:[%s3230_s16 + $0x68] sm:$0xff] %vm338_vm0, %v2084_v10  ;;  %v1578_v12 = vsub.f32 %v2084_v10, %v2213_v38  ;;  %v1650_v23 = vsel %vm338_vm0, %v1608_v27, 0.0  ;;  %v2223_v10 = vld [vmem:[%s2467_s28 + $0xb8] sm:$0xff] }
 0x399   : > { %v1647_v51 = vadd.f32 %v1646_v34, %v1645_v41  ;;  %v1434_v15 = vpop.f32.mrf.mxu1 }
 0x39a   : > { %v1648_v40 = vsel %vm338_vm0, %v1607_v28, 0.0  ;;  %1545 = vst.msk [vmem:[%s3230_s16 + $0x60] sm:$0xff] %vm338_vm0, %v1434_v15  ;;  %v1577_v52 = vsub.f32 %v1434_v15, %v2214_v24  ;;  %v1610_v4 = vmul.f32 %v1578_v12, %v1578_v12  ;;  %v2224_v12 = vld [vmem:[%s2467_s28 + $0xb0] sm:$0xff] }
 0x39b   : > { %v1649_v8 = vadd.f32 %v1648_v40, %v1647_v51  ;;  %v2087_v25 = vpop.f32.mrf.mxu1 }
 0x39c   : > { %v1609_v45 = vmul.f32 %v1577_v52, %v1577_v52  ;;  %1548 = vst.msk [vmem:[%s3230_s16 + $0x78] sm:$0xff] %vm338_vm0, %v2087_v25  ;;  %v1580_v5 = vsub.f32 %v2087_v25, %v2215_v55  ;;  %v1654_v2 = vsel %vm338_vm0, %v1610_v4, 0.0  ;;  %v2225_v25 = vld [vmem:[%s2467_s28 + $0xc8] sm:$0xff] }
 0x39d   : > { %v1651_v33 = vadd.f32 %v1650_v23, %v1649_v8  ;;  %v1444_v9 = vpop.f32.mrf.mxu1 }
 0x39e   : > { %v1652_v35 = vsel %vm338_vm0, %v1609_v45, 0.0  ;;  %1547 = vst.msk [vmem:[%s3230_s16 + $0x70] sm:$0xff] %vm338_vm0, %v1444_v9  ;;  %v1579_v46 = vsub.f32 %v1444_v9, %v2216_v62  ;;  %v1612_v57 = vmul.f32 %v1580_v5, %v1580_v5  ;;  %v2226_v5 = vld [vmem:[%s2467_s28 + $0xc0] sm:$0xff] }
 0x39f   : > { %v1653_v26 = vadd.f32 %v1652_v35, %v1651_v33  ;;  %v2090_v61 = vpop.f32.mrf.mxu1 }
 0x3a0   : > { %v1611_v63 = vmul.f32 %v1579_v46, %v1579_v46  ;;  %1550 = vst.msk [vmem:[%s3230_s16 + $0x88] sm:$0xff] %vm338_vm0, %v2090_v61  ;;  %v1582_v3 = vsub.f32 %v2090_v61, %v2217_v16  ;;  %v1658_v44 = vsel %vm338_vm0, %v1612_v57, 0.0  ;;  %v2227_v61 = vld [vmem:[%s2467_s28 + $0xd8] sm:$0xff] }
 0x3a1   : > { %v1655_v19 = vadd.f32 %v1654_v2, %v1653_v26  ;;  %v1454_v18 = vpop.f32.mrf.mxu1 }
 0x3a2   : > { %v1656_v42 = vsel %vm338_vm0, %v1611_v63, 0.0  ;;  %1549 = vst.msk [vmem:[%s3230_s16 + $0x80] sm:$0xff] %vm338_vm0, %v1454_v18  ;;  %v1581_v17 = vsub.f32 %v1454_v18, %v2218_v32  ;;  %v1614_v48 = vmul.f32 %v1582_v3, %v1582_v3  ;;  %v2228_v3 = vld [vmem:[%s2467_s28 + $0xd0] sm:$0xff] }
 0x3a3   : > { %v1657_v14 = vadd.f32 %v1656_v42, %v1655_v19  ;;  %v2093_v7 = vpop.f32.mrf.mxu1 }
 0x3a4   : > { %v1613_v53 = vmul.f32 %v1581_v17, %v1581_v17  ;;  %1552 = vst.msk [vmem:[%s3230_s16 + $0x98] sm:$0xff] %vm338_vm0, %v2093_v7  ;;  %v1584_v13 = vsub.f32 %v2093_v7, %v2219_v22  ;;  %v1662_v43 = vsel %vm338_vm0, %v1614_v48, 0.0  ;;  %v2229_v7 = vld [vmem:[%s2467_s28 + $0xe8] sm:$0xff] }
 0x3a5   : > { %v1659_v60 = vadd.f32 %v1658_v44, %v1657_v14  ;;  %v1464_v6 = vpop.f32.mrf.mxu1 }
 0x3a6   : > { %v1660_v1 = vsel %vm338_vm0, %v1613_v53, 0.0  ;;  %1551 = vst.msk [vmem:[%s3230_s16 + $0x90] sm:$0xff] %vm338_vm0, %v1464_v6  ;;  %v1583_v11 = vsub.f32 %v1464_v6, %v2220_v39  ;;  %v1616_v50 = vmul.f32 %v1584_v13, %v1584_v13  ;;  %v2230_v13 = vld [vmem:[%s2467_s28 + $0xe0] sm:$0xff] }
 0x3a7   : > { %v1661_v54 = vadd.f32 %v1660_v1, %v1659_v60  ;;  %v2096_v20 = vpop.f32.mrf.mxu1 }
 0x3a8   : > { %v1615_v49 = vmul.f32 %v1583_v11, %v1583_v11  ;;  %1554 = vst.msk [vmem:[%s3230_s16 + $0xa8] sm:$0xff] %vm338_vm0, %v2096_v20  ;;  %v1586_v37 = vsub.f32 %v2096_v20, %v2221_v56  ;;  %v1666_v0 = vsel %vm338_vm0, %v1616_v50, 0.0  ;;  %v2231_v20 = vld [vmem:[%s2467_s28 + $0xf8] sm:$0xff] }
 0x3a9   : > { %v1663_v30 = vadd.f32 %v1662_v43, %v1661_v54  ;;  %v1474_v58 = vpop.f32.mrf.mxu1 }
 0x3aa   : > { %v1664_v36 = vsel %vm338_vm0, %v1615_v49, 0.0  ;;  %1553 = vst.msk [vmem:[%s3230_s16 + $0xa0] sm:$0xff] %vm338_vm0, %v1474_v58  ;;  %v1585_v59 = vsub.f32 %v1474_v58, %v2222_v29  ;;  %v1618_v31 = vmul.f32 %v1586_v37, %v1586_v37  ;;  %v2232_v37 = vld [vmem:[%s2467_s28 + $0xf0] sm:$0xff] }
 0x3ab   : > { %v1665_v21 = vadd.f32 %v1664_v36, %v1663_v30  ;;  %v2099_v47 = vpop.f32.mrf.mxu1 }
 0x3ac   : > { %v1617_v41 = vmul.f32 %v1585_v59, %v1585_v59  ;;  %1556 = vst.msk [vmem:[%s3230_s16 + $0xb8] sm:$0xff] %vm338_vm0, %v2099_v47  ;;  %v1588_v34 = vsub.f32 %v2099_v47, %v2223_v10  ;;  %v1670_v24 = vsel %vm338_vm0, %v1618_v31, 0.0 }
 0x3ad   : > { %v1667_v27 = vadd.f32 %v1666_v0, %v1665_v21  ;;  %v1484_v28 = vpop.f32.mrf.mxu1 }
 0x3ae   : > { %v1668_v38 = vsel %vm338_vm0, %v1617_v41, 0.0  ;;  %1555 = vst.msk [vmem:[%s3230_s16 + $0xb0] sm:$0xff] %vm338_vm0, %v1484_v28  ;;  %v1587_v51 = vsub.f32 %v1484_v28, %v2224_v12  ;;  %v1620_v52 = vmul.f32 %v1588_v34, %v1588_v34 }
 0x3af   : > { %v1669_v15 = vadd.f32 %v1668_v38, %v1667_v27  ;;  %v2102_v40 = vpop.f32.mrf.mxu1 }
 0x3b0   : > { %v1619_v8 = vmul.f32 %v1587_v51, %v1587_v51  ;;  %1558 = vst.msk [vmem:[%s3230_s16 + $0xc8] sm:$0xff] %vm338_vm0, %v2102_v40  ;;  %v1590_v23 = vsub.f32 %v2102_v40, %v2225_v25  ;;  %v1674_v62 = vsel %vm338_vm0, %v1620_v52, 0.0 }
 0x3b1   : > { %v1671_v4 = vadd.f32 %v1670_v24, %v1669_v15  ;;  %v1494_v45 = vpop.f32.mrf.mxu1 }
 0x3b2   : > { %v1672_v55 = vsel %vm338_vm0, %v1619_v8, 0.0  ;;  %1557 = vst.msk [vmem:[%s3230_s16 + $0xc0] sm:$0xff] %vm338_vm0, %v1494_v45  ;;  %v1589_v33 = vsub.f32 %v1494_v45, %v2226_v5  ;;  %v1622_v46 = vmul.f32 %v1590_v23, %v1590_v23 }
 0x3b3   : > { %v1673_v9 = vadd.f32 %v1672_v55, %v1671_v4  ;;  %v2105_v35 = vpop.f32.mrf.mxu1 }
 0x3b4   : > { %v1621_v26 = vmul.f32 %v1589_v33, %v1589_v33  ;;  %1560 = vst.msk [vmem:[%s3230_s16 + $0xd8] sm:$0xff] %vm338_vm0, %v2105_v35  ;;  %v1592_v2 = vsub.f32 %v2105_v35, %v2227_v61  ;;  %v1678_v32 = vsel %vm338_vm0, %v1622_v46, 0.0 }
 0x3b5   : > { %v1675_v57 = vadd.f32 %v1674_v62, %v1673_v9  ;;  %v1504_v63 = vpop.f32.mrf.mxu1 }
 0x3b6   : > { %v1676_v16 = vsel %vm338_vm0, %v1621_v26, 0.0  ;;  %1559 = vst.msk [vmem:[%s3230_s16 + $0xd0] sm:$0xff] %vm338_vm0, %v1504_v63  ;;  %v1591_v19 = vsub.f32 %v1504_v63, %v2228_v3  ;;  %v1624_v17 = vmul.f32 %v1592_v2, %v1592_v2 }
 0x3b7   : > { %v1677_v18 = vadd.f32 %v1676_v16, %v1675_v57  ;;  %v2108_v42 = vpop.f32.mrf.mxu1 }
 0x3b8   : > { %v1623_v14 = vmul.f32 %v1591_v19, %v1591_v19  ;;  %1562 = vst.msk [vmem:[%s3230_s16 + $0xe8] sm:$0xff] %vm338_vm0, %v2108_v42  ;;  %v1594_v44 = vsub.f32 %v2108_v42, %v2229_v7  ;;  %v1682_v39 = vsel %vm338_vm0, %v1624_v17, 0.0 }
 0x3b9   : > { %v1679_v48 = vadd.f32 %v1678_v32, %v1677_v18  ;;  %v1514_v53 = vpop.f32.mrf.mxu1 }
 0x3ba   : > { %v1680_v22 = vsel %vm338_vm0, %v1623_v14, 0.0  ;;  %1561 = vst.msk [vmem:[%s3230_s16 + $0xe0] sm:$0xff] %vm338_vm0, %v1514_v53  ;;  %v1593_v60 = vsub.f32 %v1514_v53, %v2230_v13  ;;  %v1626_v11 = vmul.f32 %v1594_v44, %v1594_v44 }
 0x3bb   : > { %v1681_v6 = vadd.f32 %v1680_v22, %v1679_v48  ;;  %v2111_v1 = vpop.f32.mrf.mxu1 }
 0x3bc   : > { %v1625_v54 = vmul.f32 %v1593_v60, %v1593_v60  ;;  %1564 = vst.msk [vmem:[%s3230_s16 + $0xf8] sm:$0xff] %vm338_vm0, %v2111_v1  ;;  %v1596_v43 = vsub.f32 %v2111_v1, %v2231_v20  ;;  %v1686_v36 = vsel %vm338_vm0, %v1626_v11, 0.0 }
 0x3bd   : > { %v1683_v50 = vadd.f32 %v1682_v39, %v1681_v6  ;;  %v1524_v49 = vpop.f32.mrf.mxu1 }
 0x3be   : > { %v1684_v56 = vsel %vm338_vm0, %v1625_v54, 0.0  ;;  %1563 = vst.msk [vmem:[%s3230_s16 + $0xf0] sm:$0xff] %vm338_vm0, %v1524_v49  ;;  %v1595_v30 = vsub.f32 %v1524_v49, %v2232_v37  ;;  %v1628_v29 = vmul.f32 %v1596_v43, %v1596_v43 }
 0x3bf   : > { %v1685_v58 = vadd.f32 %v1684_v56, %v1683_v50 }
 0x3c0   : > { %v1627_v59 = vmul.f32 %v1595_v30, %v1595_v30  ;;  %v1690_v31 = vsel %vm338_vm0, %v1628_v29, 0.0 }
 0x3c1   : > { %v1687_v21 = vadd.f32 %v1686_v36, %v1685_v58 }
 0x3c2   : > { %v1688_v47 = vsel %vm338_vm0, %v1627_v59, 0.0 }
 0x3c3   : > { %v1689_v0 = vadd.f32 %v1688_v47, %v1687_v21 }
 0x3c5   : > { %v1691_v41 = vadd.f32 %v1690_v31, %v1689_v0 }
 0x3c7   : > { %1692 = vadd.xlane.f32.xlu0 %v1691_v41 }
 0x3c8   : > { %2274 = shalt.err (!%p2271_p10)
}
 0x3c9   : > { %s2275_s26 = scalar_lea.hbm %s3365_s7, 4096  ;;  %s2279_s15 = scalar_lea.hbm %s3419_s4, 8192 }
 0x3ca   : > { %p2276_p0 = scmp.ne.s32.totalorder %s3365_s7, %s2275_s26  ;;  %p2280_p1 = scmp.lt.s32.totalorder %s3365_s7, %s3419_s4 }
 0x3cb   : > { %p2281_p3 = scmp.lt.s32.totalorder %s2279_s15, %s2275_s26 }
 0x3cc   : > { %p2277_p2 = pnand %p2276_p0, %p3463_p12 }
 0x3cd   : > { %p2282_p6 = por %p2281_p3, %p2280_p1 }
 0x3ce   : > { %p2278_p9 = pneg %p2277_p2 }
 0x3d0   : > { %p2283_p11 = pnand %p2282_p6, %p2278_p9 }
 0x3d2   : > { %2286 = shalt.err (!%p2283_p11)
}
 0x3d3   : > { %s2332_s29 = smov 128   ;;  %s2333_s28 = smov 8  }
 0x3d4   : > { %2148 = dma.vmem_to_hbm [thread:$0]  (%p3463_p12), %s3367_s8, 4096, %s3365_s7, %s1705_s9, %s2332_s29, %s2332_s29, %s2333_s28  }
 0x3d5   : > { %p252_p13 = scmp.lt.s32.totalorder %s2385_s22, 1 }
 0x3d7   : > { %s3471_s22 = smov (!%p252_p13, %s2385_s22), 1 }
 0x3d8   : > { %s1831_s10 = sshll.u32 %s3471_s22, 3 }
 0x3d9   : > { %s255_s17 = scalar_lea.vmem %s3420_s5, %s1831_s10 }
 0x450   : > { %v1693_v10 = vpop.xlane.xlu0 %1692 }
 0x451   : > { %v1694_v34 = vrot.slane %v1693_v10, 4 }
 0x453   : > { %v1695_v27 = vadd.f32 %v1694_v34, %v1693_v10 }
 0x455   : > { %v1696_v28 = vrot.slane %v1695_v27, 2 }
 0x457   : > { %v1697_v38 = vadd.f32 %v1696_v28, %v1695_v27 }
 0x459   : > { %v1698_v12 = vrot.slane %v1697_v38, 1 }
 0x45b   : > { %v1699_v51 = vadd.f32 %v1698_v12, %v1697_v38 }
 0x45d   : > { %2144 = vpush %v1699_v51 }
 0x48e   : > { %s2145_s26 = spop %2144 }
 0x48f   : > { %v1701_v15 = vstv %s2145_s26 }
 0x490   : > { %1703 = vst [vmem:[%s255_s17] sm:$0xff] %v1701_v15 }
 0x491 PF: > { %s1740_s30 = sand.u32 1, %s2313_s18   ;;  %p3464_p12 = scmp.ne.s32.totalorder %s3438_s6, 0 }
 0x492   : > { %p3465_p4 = scmp.ge.s32.totalorder %s2325_s21, 2  ;;  %s1741_s23 = scalar_lea.sflag [#allocation4], %s1740_s30 }
 0x494   : > { %p2155_p5 = pnand %p3465_p4, %p3464_p12 }
 0x496   : > { %p2156_p7 = pneg %p2155_p5 }
 0x498   : > { %2308 = dma.done.wait (%p2156_p7), %s1741_s23, 4096  }
 0x499   : > { %2310 = vsyncadd (%p2156_p7), %s1741_s23, 4294963200  ;;  %p19_p8 = scmp.ge.s32.totalorder %s2389_s24, 4   ;;  %s3466_s18 = smov %s2317_s19 }
 0x49a   : > { %s3467_s19 = smov %s2321_s20  ;;  %s3468_s20 = smov %s2401_s27 }
 0x49b   : > { %s3469_s21 = smov %s2389_s24  ;;  %21 = sbr.rel (!%p19_p8) target bundleno = 5 (0x5), region = 93 }
 0x4a0   :  { %1753 = vsyncpa [#allocation3], 1 }
 0x4a1   :  { %1755 = vsyncpa [#allocation3 + $0x1], 1 }
 0x4a2   :  { %1756 = vsyncpa [#allocation4], 1 }
 0x4a3   :  { %1758 = vsyncpa [#allocation4 + $0x1], 1 }

</bundles_post_ra>
